<compile_context>
chip_gen: v7x
topology: tpu7x:2x2x1
jax: 0.10.0
libtpu: 0.0.40
codegen_flags: <defaults>
</compile_context>

<pallas_src>
import math

import jax
import jax.numpy as jnp
from jax.experimental import pallas as pl
from jax.experimental.pallas import tpu as pltpu

_SQRT2_INV = 0.7071067811865476
_N_DMPNN_PARAMS = 11
_N_ATTN_PARAMS = 6
_N_READ_PARAMS = 5


def _gelu(x):
    # exact (erf-based) GELU, matching torch.nn.GELU() default numerics
    return 0.5 * x * (1.0 + jax.lax.erf(x * _SQRT2_INV))


def _mm(x, w):
    """x @ w, routed to the VPU (broadcast multiply) when the K dim is 1."""
    if w.shape[0] == 1:
        return x * w  # (R,1) * (1,N) broadcast -> (R,N); pure VPU, no MXU pop
    return jnp.dot(x, w, preferred_element_type=jnp.float32)


def _one_hots(send_col, recv_col, recv_row, num_nodes):
    """Build gather / scatter one-hot matrices in-kernel from int32 indices."""
    num_edges = send_col.shape[0]
    one = jnp.float32(1.0)
    zero = jnp.float32(0.0)
    iota_en = jax.lax.broadcasted_iota(jnp.int32, (num_edges, num_nodes), 1)
    g_i = jnp.where(send_col == iota_en, one, zero)   # gather sender rows
    g_j = jnp.where(recv_col == iota_en, one, zero)   # gather receiver rows
    iota_ne = jax.lax.broadcasted_iota(jnp.int32, (num_nodes, num_edges), 0)
    s_j = jnp.where(recv_row == iota_ne, one, zero)   # scatter-add to receiver
    # TODO(synk): s_j == g_j.T -- replace with a transposed-lhs dot_general (or
    # index-based gather/scatter for big graphs) to drop one (N,E) buffer.
    return g_i, g_j, s_j


def _dmpnn(node, edge, g_i, g_j, s_j, p):
    """One DMPNNLayer forward (use_residual=True, dropout == Identity)."""
    (w1a, w1b, w1c, b1, w2, b2, c1a, c1b, d1, c2, d2) = p
    f32 = jnp.float32
    # gather sender / receiver node vectors via one-hot matmul (MXU)
    ni = jnp.dot(g_i, node, preferred_element_type=f32)
    nj = jnp.dot(g_j, node, preferred_element_type=f32)
    # message MLP; torch.cat([ni, nj, edge], 1) @ W1 as split matmuls
    h = _gelu(_mm(ni, w1a) + _mm(nj, w1b) + _mm(edge, w1c) + b1)
    msgs = _gelu(_mm(h, w2) + b2)
    # index_add_ over the receiver node as a one-hot matmul (MXU)
    boxes = jnp.dot(s_j, msgs, preferred_element_type=f32)
    # combination MLP; torch.cat([node, boxes], 1) @ C1 as split matmuls
    g = _gelu(_mm(node, c1a) + _mm(boxes, c1b) + d1)
    comb = _gelu(_mm(g, c2) + d2)
    return node + comb  # use_residual=True


def _build_fused_kernel(has_dihedral, num_passes):
    def kernel(*refs):
        refs = list(refs)
        pos = 0

        def take(n):
            nonlocal pos
            out = refs[pos:pos + n]
            pos += n
            return out

        atomic_ref, bond_ref, angle_ref, glob_ref = take(4)
        dihedral_ref = take(1)[0] if has_dihedral else None
        b_send, b_recv, b_recv_row = take(3)
        a_send, a_recv, a_recv_row = take(3)
        if has_dihedral:
            d_send, d_recv, d_recv_row = take(3)
        p_atom = [r[...] for r in take(_N_DMPNN_PARAMS)]
        p_bond = [r[...] for r in take(_N_DMPNN_PARAMS)]
        p_angle = ([r[...] for r in take(_N_DMPNN_PARAMS)]
                   if has_dihedral else None)
        p_attn = [r[...] for r in take(_N_ATTN_PARAMS)]
        p_read = [r[...] for r in take(_N_READ_PARAMS)]
        out_ref = take(1)[0]
        f32 = jnp.float32

        # ---- hoisted: load this molecule's state, build one-hot matrices ----
        atomic0 = atomic_ref[...]
        bond0 = bond_ref[...]
        angle0 = angle_ref[...]
        n_atoms = atomic0.shape[0]
        n_bonds = bond0.shape[0]
        n_angles = angle0.shape[0]

        gb_i, gb_j, sb_j = _one_hots(b_send[...], b_recv[...],
                                     b_recv_row[...], n_atoms)
        ga_i, ga_j, sa_j = _one_hots(a_send[...], a_recv[...],
                                     a_recv_row[...], n_bonds)
        if has_dihedral:
            dihedral = dihedral_ref[...]
            gd_i, gd_j, sd_j = _one_hots(d_send[...], d_recv[...],
                                         d_recv_row[...], n_angles)

        # ---- message passing: fori_loop carry bounds live ranges ----
        def one_pass(_, carry):
            atomic, bond, angle = carry
            if has_dihedral:
                angle = _dmpnn(angle, dihedral, gd_i, gd_j, sd_j, p_angle)
            bond = _dmpnn(bond, angle, ga_i, ga_j, sa_j, p_bond)
            atomic = _dmpnn(atomic, bond, gb_i, gb_j, sb_j, p_atom)
            return atomic, bond, angle

        atomic, bond, angle = jax.lax.fori_loop(
            0, num_passes, one_pass, (atomic0, bond0, angle0))

        # ---- AggregateSelfAttention readout ----
        wq, bq, wk, bk, wv, bv = p_attn
        q = jnp.dot(atomic, wq, preferred_element_type=f32) + bq
        k = jnp.dot(atomic, wk, preferred_element_type=f32) + bk
        v = jnp.dot(atomic, wv, preferred_element_type=f32) + bv
        dot = jnp.sum(q * k, axis=1, keepdims=True)              # [n_atoms, 1]
        m = jnp.max(dot, axis=0, keepdims=True)
        e = jnp.exp(dot - m)
        attn = e / jnp.sum(e, axis=0, keepdims=True)             # softmax, dim 0
        # TODO(synk): route the weighted sum through the MXU (attn^T @ v) once
        # graphs are large enough for the cross-sublane reduction to matter.
        readout_vec = jnp.sum(attn * v, axis=0, keepdims=True)   # [1, A]

        # ---- readout MLP, fused with concat([readout_vec, glob]) ----
        w1a, w1f, b1, w2, b2 = p_read
        h = (jnp.dot(readout_vec, w1a, preferred_element_type=f32)
             + jnp.dot(glob_ref[...], w1f, preferred_element_type=f32)
             + b1)
        h = jnp.where(h >= 0.0, h, 0.01 * h)                     # LeakyReLU(0.01)
        out_ref[...] = jnp.dot(h, w2, preferred_element_type=f32) + b2

    return kernel


# ---------------------------------------------------------------------------
# Cost / VMEM sizing helpers (advisory, per perf review)
# ---------------------------------------------------------------------------
def _padded_onehot_bytes(n, e):
    pad8 = lambda v: ((v + 7) // 8) * 8
    pad128 = lambda v: ((v + 127) // 128) * 128
    return 4 * (2 * pad8(e) * pad128(n) + pad8(n) * pad128(e))


def _estimate_cost(n_mols, num_passes, levels, n_atoms, A, F, T,
                   in_bytes, out_bytes):
    flops = 0
    trans = 0
    for N, E, n, ed in levels:
        hm = (2 * n + ed) // 2
        hc = 3 * n // 2
        flops += 4 * E * N * n                            # one-hot gathers
        flops += 2 * E * ((2 * n + ed) * hm + hm * n)     # message MLP
        flops += 2 * N * E * n                            # one-hot scatter-add
        flops += 2 * N * (2 * n * hc + hc * n)            # combination MLP
        trans += E * (hm + n) + N * (hc + n)              # erf per GELU output
    flops *= num_passes
    trans *= num_passes
    flops += 6 * n_atoms * A * A + 4 * n_atoms * A        # q/k/v, dot, wsum
    trans += n_atoms                                      # softmax exp
    flops += 2 * (A + F) * 30 + 2 * 30 * T                # readout MLP
    return pl.CostEstimate(flops=int(n_mols * flops),
                           transcendentals=int(n_mols * trans),
                           bytes_accessed=int(in_bytes + out_bytes))


def _vmem_limit_bytes(kernel_inputs, out_bytes, levels):
    onehot = sum(_padded_onehot_bytes(N, E) for N, E, _, _ in levels)
    per_step = sum(int(x.size) * x.dtype.itemsize for x in kernel_inputs)
    est = 2 * (per_step + out_bytes) + onehot + (8 << 20)   # dbl-buf + slack
    return int(min(64 << 20, max(32 << 20, est)))           # portable to v7x


# ---------------------------------------------------------------------------
# Wrappers
# ---------------------------------------------------------------------------
def gnn3dihed_forward_batched(params, inputs, number_of_message_passes=3):
    """Batched forward. Every molecule in the batch must share (padded) graph
    sizes. Returns [n_mols, n_targets]."""
    p_atom, p_bond, p_angle, p_attn, p_read = params
    (atomic, bond, angle, dihedral, glob,
     bond_idx, angle_idx, dihedral_idx) = inputs

    atomic = jnp.asarray(atomic, jnp.float32)
    bond = jnp.asarray(bond, jnp.float32)
    angle = jnp.asarray(angle, jnp.float32)
    dihedral = jnp.asarray(dihedral, jnp.float32)
    glob = jnp.asarray(glob, jnp.float32)

    n_mols, n_atoms, A = atomic.shape
    _, n_bonds, B = bond.shape
    n_angles = angle.shape[1]
    n_dihedrals = dihedral.shape[1]
    F = glob.shape[1]
    has_dihedral = n_dihedrals != 0          # static shape check, like torch
    assert n_bonds > 0 and n_angles > 0, "empty bond/angle graphs unsupported"

    def idx_split(idx):
        idx = jnp.asarray(idx, jnp.int32)
        return (idx[:, :, 0:1], idx[:, :, 1:2],
                idx[:, :, 1].reshape(n_mols, 1, -1))

    kernel_inputs = [atomic, bond,
                     angle.reshape(n_mols, n_angles, 1),
                     glob.reshape(n_mols, 1, F)]
    if has_dihedral:
        kernel_inputs.append(dihedral.reshape(n_mols, n_dihedrals, 1))
    kernel_inputs += list(idx_split(bond_idx))
    kernel_inputs += list(idx_split(angle_idx))
    if has_dihedral:
        kernel_inputs += list(idx_split(dihedral_idx))
    n_graph_inputs = len(kernel_inputs)

    weights = list(p_atom) + list(p_bond)
    if has_dihedral:
        weights += list(p_angle)
    weights += list(p_attn) + list(p_read)
    weights = [jnp.asarray(w, jnp.float32) for w in weights]
    kernel_inputs += weights

    # per-molecule blocks: batch axis squeezed, full graph extents per block
    graph_specs = [pl.BlockSpec((None,) + tuple(x.shape[1:]),
                                lambda m: (m, 0, 0))
                   for x in kernel_inputs[:n_graph_inputs]]
    # weights/biases: whole array, same block every grid step -> stays resident
    weight_specs = [pl.BlockSpec(tuple(w.shape), lambda m: (0, 0))
                    for w in weights]
    in_specs = graph_specs + weight_specs

    n_targets = p_read[3].shape[1]           # readout W2: (30, T)
    out_shape = jax.ShapeDtypeStruct((n_mols, 1, n_targets), jnp.float32)
    out_specs = pl.BlockSpec((None, 1, n_targets), lambda m: (m, 0, 0))
    out_bytes = n_mols * n_targets * 4

    levels = [(n_atoms, n_bonds, A, B), (n_bonds, n_angles, B, 1)]
    if has_dihedral:
        levels.append((n_angles, n_dihedrals, 1, 1))

    in_bytes = sum(int(x.size) * x.dtype.itemsize for x in kernel_inputs)
    cost = _estimate_cost(n_mols, number_of_message_passes, levels,
                          n_atoms, A, F, n_targets, in_bytes, out_bytes)
    vmem_limit = _vmem_limit_bytes(kernel_inputs, out_bytes, levels)

    out = pl.pallas_call(
        _build_fused_kernel(has_dihedral, number_of_message_passes),
        grid=(n_mols,),
        out_shape=out_shape,
        in_specs=in_specs,
        out_specs=out_specs,
        compiler_params=pltpu.CompilerParams(
            dimension_semantics=("parallel",),   # shards batch over v7x cores
            vmem_limit_bytes=vmem_limit),
        cost_estimate=cost,
    )(*kernel_inputs)
    return out.reshape(n_mols, n_targets)


def gnn3dihed_forward(params, inputs, number_of_message_passes=3):
    """Single-molecule forward matching the torch module's signature."""
    batched = tuple(jnp.asarray(x)[None] for x in inputs)
    return gnn3dihed_forward_batched(params, batched,
                                     number_of_message_passes)[0]


# ---------------------------------------------------------------------------
# Parameter construction (deterministic, synthetic; shapes per module __init__)
# ---------------------------------------------------------------------------
def linear_params(key, fan_in, fan_out):
    kw, kb = jax.random.split(key)
    bound = 1.0 / math.sqrt(fan_in)
    w = jax.random.uniform(kw, (fan_in, fan_out), jnp.float32, -bound, bound)
    b = jax.random.uniform(kb, (1, fan_out), jnp.float32, -bound, bound)
    return w, b


def make_dmpnn_params(key, n, ed):
    hm = (2 * n + ed) // 2
    hc = 3 * n // 2
    k1, k2, k3, k4 = jax.random.split(key, 4)
    w1, b1 = linear_params(k1, 2 * n + ed, hm)
    w2, b2 = linear_params(k2, hm, n)
    c1, d1 = linear_params(k3, 2 * n, hc)
    c2, d2 = linear_params(k4, hc, n)
    # split W1 / C1 so torch.cat([...], 1) @ W becomes a sum of matmuls
    return (w1[:n], w1[n:2 * n], w1[2 * n:], b1, w2, b2,
            c1[:n], c1[n:], d1, c2, d2)


def make_attn_params(key, emb):
    kq, kk, kv = jax.random.split(key, 3)
    wq, bq = linear_params(kq, emb, emb)
    wk, bk = linear_params(kk, emb, emb)
    wv, bv = linear_params(kv, emb, emb)
    return (wq, bq, wk, bk, wv, bv)


def make_readout_params(key, atomic_size, n_features, n_targets):
    k1, k2 = jax.random.split(key)
    w1, b1 = linear_params(k1, atomic_size + n_features, 30)
    w2, b2 = linear_params(k2, 30, n_targets)
    # split W1 so concat([attention_readout, glob]) @ W1 becomes two matmuls
    return (w1[:atomic_size], w1[atomic_size:], b1, w2, b2)


# ---------------------------------------------------------------------------
# Pure-JAX reference (numerical check of the fused kernel), single molecule
# ---------------------------------------------------------------------------
def _reference_forward(params, inputs, number_of_message_passes=3):
    p_atom, p_bond, p_angle, p_attn, p_read = params
    (atomic, bond, angle, dihedral, glob,
     bond_idx, angle_idx, dihedral_idx) = inputs

    def dmpnn(node, edge, idx, p):
        w1a, w1b, w1c, b1, w2, b2, c1a, c1b, d1, c2, d2 = p
        ni = node[idx[:, 0]]
        nj = node[idx[:, 1]]
        h = _gelu(ni @ w1a + nj @ w1b + edge @ w1c + b1)
        msgs = _gelu(h @ w2 + b2)
        boxes = jnp.zeros_like(node).at[idx[:, 1]].add(msgs)
        g = _gelu(node @ c1a + boxes @ c1b + d1)
        comb = _gelu(g @ c2 + d2)
        return node + comb

    angle = angle.reshape(-1, 1)
    dihedral = dihedral.reshape(-1, 1)
    for _ in range(number_of_message_passes):
        if dihedral.shape[0] != 0:
            angle = dmpnn(angle, dihedral, dihedral_idx, p_angle)
        bond = dmpnn(bond, angle, angle_idx, p_bond)
        atomic = dmpnn(atomic, bond, bond_idx, p_atom)

    wq, bq, wk, bk, wv, bv = p_attn
    q = atomic @ wq + bq
    k = atomic @ wk + bk
    v = atomic @ wv + bv
    attn = jax.nn.softmax(jnp.sum(q * k, axis=1), axis=0)
    readout_vec = attn @ v
    w1a, w1f, b1, w2, b2 = p_read
    h = readout_vec @ w1a + glob @ w1f + b1[0]
    h = jnp.where(h >= 0.0, h, 0.01 * h)
    return h @ w2 + b2[0]


if __name__ == "__main__":
    key = jax.random.PRNGKey(0)

    # model sizes
    A = 16   # atomic_vector_size
    B = 8    # bond_vector_size
    F = 4    # number_of_molecular_features
    T = 3    # number_of_targets

    # graph sizes (shared / padded within the batch)
    M = 2    # molecules in the batch (one per grid step)
    n_atoms, n_bonds, n_angles, n_dihedrals = 10, 12, 14, 6

    ks = jax.random.split(key, 16)
    atomic = jax.random.normal(ks[0], (M, n_atoms, A), jnp.float32)
    bond = jax.random.normal(ks[1], (M, n_bonds, B), jnp.float32)
    angle = jax.random.normal(ks[2], (M, n_angles), jnp.float32)
    dihedral = jax.random.normal(ks[3], (M, n_dihedrals), jnp.float32)
    glob = jax.random.normal(ks[4], (M, F), jnp.float32)
    bond_idx = jax.random.randint(ks[5], (M, n_bonds, 2), 0, n_atoms, jnp.int32)
    angle_idx = jax.random.randint(ks[6], (M, n_angles, 2), 0, n_bonds, jnp.int32)
    dihedral_idx = jax.random.randint(ks[7], (M, n_dihedrals, 2), 0, n_angles,
                                      jnp.int32)

    p_atom = make_dmpnn_params(ks[8], A, B)      # atom_bond_operator
    p_bond = make_dmpnn_params(ks[9], B, 1)      # bond_angle_operator
    p_angle = make_dmpnn_params(ks[10], 1, 1)    # angle_dihedral_operator
    p_attn = make_attn_params(ks[11], A)         # readout_aggregator
    p_read = make_readout_params(ks[12], A, F, T)
    params = (p_atom, p_bond, p_angle, p_attn, p_read)

    inputs = (atomic, bond, angle, dihedral, glob,
              bond_idx, angle_idx, dihedral_idx)

    out = gnn3dihed_forward_batched(params, inputs, number_of_message_passes=3)
    out = jax.block_until_ready(out)
    assert out.shape == (M, T)

    refs = []
    for m in range(M):
        mol = (atomic[m], bond[m], angle[m], dihedral[m], glob[m],
               bond_idx[m], angle_idx[m], dihedral_idx[m])
        refs.append(_reference_forward(params, mol, number_of_message_passes=3))
    ref = jnp.stack(refs)
    assert jnp.allclose(out, ref, rtol=2e-3, atol=2e-3), (out, ref)

    print("KERNEL_OK")
</pallas_src>

<mosaic_0001>
module attributes {stable_mosaic.version = 11 : i64} {
  func.func @kernel(%arg0: i32, %arg1: memref<1x10x16xf32, #tpu.memory_space<vmem>>, %arg2: memref<1x12x8xf32, #tpu.memory_space<vmem>>, %arg3: memref<1x14x1xf32, #tpu.memory_space<vmem>>, %arg4: memref<1x1x4xf32, #tpu.memory_space<vmem>>, %arg5: memref<1x6x1xf32, #tpu.memory_space<vmem>>, %arg6: memref<1x12x1xi32, #tpu.memory_space<vmem>>, %arg7: memref<1x12x1xi32, #tpu.memory_space<vmem>>, %arg8: memref<1x1x12xi32, #tpu.memory_space<vmem>>, %arg9: memref<1x14x1xi32, #tpu.memory_space<vmem>>, %arg10: memref<1x14x1xi32, #tpu.memory_space<vmem>>, %arg11: memref<1x1x14xi32, #tpu.memory_space<vmem>>, %arg12: memref<1x6x1xi32, #tpu.memory_space<vmem>>, %arg13: memref<1x6x1xi32, #tpu.memory_space<vmem>>, %arg14: memref<1x1x6xi32, #tpu.memory_space<vmem>>, %arg15: memref<16x20xf32, #tpu.memory_space<vmem>>, %arg16: memref<16x20xf32, #tpu.memory_space<vmem>>, %arg17: memref<8x20xf32, #tpu.memory_space<vmem>>, %arg18: memref<1x20xf32, #tpu.memory_space<vmem>>, %arg19: memref<20x16xf32, #tpu.memory_space<vmem>>, %arg20: memref<1x16xf32, #tpu.memory_space<vmem>>, %arg21: memref<16x24xf32, #tpu.memory_space<vmem>>, %arg22: memref<16x24xf32, #tpu.memory_space<vmem>>, %arg23: memref<1x24xf32, #tpu.memory_space<vmem>>, %arg24: memref<24x16xf32, #tpu.memory_space<vmem>>, %arg25: memref<1x16xf32, #tpu.memory_space<vmem>>, %arg26: memref<8x8xf32, #tpu.memory_space<vmem>>, %arg27: memref<8x8xf32, #tpu.memory_space<vmem>>, %arg28: memref<1x8xf32, #tpu.memory_space<vmem>>, %arg29: memref<1x8xf32, #tpu.memory_space<vmem>>, %arg30: memref<8x8xf32, #tpu.memory_space<vmem>>, %arg31: memref<1x8xf32, #tpu.memory_space<vmem>>, %arg32: memref<8x12xf32, #tpu.memory_space<vmem>>, %arg33: memref<8x12xf32, #tpu.memory_space<vmem>>, %arg34: memref<1x12xf32, #tpu.memory_space<vmem>>, %arg35: memref<12x8xf32, #tpu.memory_space<vmem>>, %arg36: memref<1x8xf32, #tpu.memory_space<vmem>>, %arg37: memref<1x1xf32, #tpu.memory_space<vmem>>, %arg38: memref<1x1xf32, #tpu.memory_space<vmem>>, %arg39: memref<1x1xf32, #tpu.memory_space<vmem>>, %arg40: memref<1x1xf32, #tpu.memory_space<vmem>>, %arg41: memref<1x1xf32, #tpu.memory_space<vmem>>, %arg42: memref<1x1xf32, #tpu.memory_space<vmem>>, %arg43: memref<1x1xf32, #tpu.memory_space<vmem>>, %arg44: memref<1x1xf32, #tpu.memory_space<vmem>>, %arg45: memref<1x1xf32, #tpu.memory_space<vmem>>, %arg46: memref<1x1xf32, #tpu.memory_space<vmem>>, %arg47: memref<1x1xf32, #tpu.memory_space<vmem>>, %arg48: memref<16x16xf32, #tpu.memory_space<vmem>>, %arg49: memref<1x16xf32, #tpu.memory_space<vmem>>, %arg50: memref<16x16xf32, #tpu.memory_space<vmem>>, %arg51: memref<1x16xf32, #tpu.memory_space<vmem>>, %arg52: memref<16x16xf32, #tpu.memory_space<vmem>>, %arg53: memref<1x16xf32, #tpu.memory_space<vmem>>, %arg54: memref<16x30xf32, #tpu.memory_space<vmem>>, %arg55: memref<4x30xf32, #tpu.memory_space<vmem>>, %arg56: memref<1x30xf32, #tpu.memory_space<vmem>>, %arg57: memref<30x3xf32, #tpu.memory_space<vmem>>, %arg58: memref<1x3xf32, #tpu.memory_space<vmem>>, %arg59: memref<1x1x3xf32, #tpu.memory_space<vmem>>) attributes {dimension_semantics = [#tpu.dimension_semantics<parallel>], iteration_bounds = array<i64: 2>, scalar_prefetch = 0 : i64, scratch_operands = 0 : i64, tpu.core_type = #tpu.core_type<tc>, window_params = [{transform_indices = @transform_0, window_bounds = array<i64: 1, 10, 16>}, {transform_indices = @transform_1, window_bounds = array<i64: 1, 12, 8>}, {transform_indices = @transform_2, window_bounds = array<i64: 1, 14, 1>}, {transform_indices = @transform_3, window_bounds = array<i64: 1, 1, 4>}, {transform_indices = @transform_4, window_bounds = array<i64: 1, 6, 1>}, {transform_indices = @transform_5, window_bounds = array<i64: 1, 12, 1>}, {transform_indices = @transform_6, window_bounds = array<i64: 1, 12, 1>}, {transform_indices = @transform_7, window_bounds = array<i64: 1, 1, 12>}, {transform_indices = @transform_8, window_bounds = array<i64: 1, 14, 1>}, {transform_indices = @transform_9, window_bounds = array<i64: 1, 14, 1>}, {transform_indices = @transform_10, window_bounds = array<i64: 1, 1, 14>}, {transform_indices = @transform_11, window_bounds = array<i64: 1, 6, 1>}, {transform_indices = @transform_12, window_bounds = array<i64: 1, 6, 1>}, {transform_indices = @transform_13, window_bounds = array<i64: 1, 1, 6>}, {pipeline_mode = #tpu.pipeline_mode<synchronous>, transform_indices = @transform_14, window_bounds = array<i64: 16, 20>}, {pipeline_mode = #tpu.pipeline_mode<synchronous>, transform_indices = @transform_15, window_bounds = array<i64: 16, 20>}, {pipeline_mode = #tpu.pipeline_mode<synchronous>, transform_indices = @transform_16, window_bounds = array<i64: 8, 20>}, {pipeline_mode = #tpu.pipeline_mode<synchronous>, transform_indices = @transform_17, window_bounds = array<i64: 1, 20>}, {pipeline_mode = #tpu.pipeline_mode<synchronous>, transform_indices = @transform_18, window_bounds = array<i64: 20, 16>}, {pipeline_mode = #tpu.pipeline_mode<synchronous>, transform_indices = @transform_19, window_bounds = array<i64: 1, 16>}, {pipeline_mode = #tpu.pipeline_mode<synchronous>, transform_indices = @transform_20, window_bounds = array<i64: 16, 24>}, {pipeline_mode = #tpu.pipeline_mode<synchronous>, transform_indices = @transform_21, window_bounds = array<i64: 16, 24>}, {pipeline_mode = #tpu.pipeline_mode<synchronous>, transform_indices = @transform_22, window_bounds = array<i64: 1, 24>}, {pipeline_mode = #tpu.pipeline_mode<synchronous>, transform_indices = @transform_23, window_bounds = array<i64: 24, 16>}, {pipeline_mode = #tpu.pipeline_mode<synchronous>, transform_indices = @transform_24, window_bounds = array<i64: 1, 16>}, {pipeline_mode = #tpu.pipeline_mode<synchronous>, transform_indices = @transform_25, window_bounds = array<i64: 8, 8>}, {pipeline_mode = #tpu.pipeline_mode<synchronous>, transform_indices = @transform_26, window_bounds = array<i64: 8, 8>}, {pipeline_mode = #tpu.pipeline_mode<synchronous>, transform_indices = @transform_27, window_bounds = array<i64: 1, 8>}, {pipeline_mode = #tpu.pipeline_mode<synchronous>, transform_indices = @transform_28, window_bounds = array<i64: 1, 8>}, {pipeline_mode = #tpu.pipeline_mode<synchronous>, transform_indices = @transform_29, window_bounds = array<i64: 8, 8>}, {pipeline_mode = #tpu.pipeline_mode<synchronous>, transform_indices = @transform_30, window_bounds = array<i64: 1, 8>}, {pipeline_mode = #tpu.pipeline_mode<synchronous>, transform_indices = @transform_31, window_bounds = array<i64: 8, 12>}, {pipeline_mode = #tpu.pipeline_mode<synchronous>, transform_indices = @transform_32, window_bounds = array<i64: 8, 12>}, {pipeline_mode = #tpu.pipeline_mode<synchronous>, transform_indices = @transform_33, window_bounds = array<i64: 1, 12>}, {pipeline_mode = #tpu.pipeline_mode<synchronous>, transform_indices = @transform_34, window_bounds = array<i64: 12, 8>}, {pipeline_mode = #tpu.pipeline_mode<synchronous>, transform_indices = @transform_35, window_bounds = array<i64: 1, 8>}, {pipeline_mode = #tpu.pipeline_mode<synchronous>, transform_indices = @transform_36, window_bounds = array<i64: 1, 1>}, {pipeline_mode = #tpu.pipeline_mode<synchronous>, transform_indices = @transform_37, window_bounds = array<i64: 1, 1>}, {pipeline_mode = #tpu.pipeline_mode<synchronous>, transform_indices = @transform_38, window_bounds = array<i64: 1, 1>}, {pipeline_mode = #tpu.pipeline_mode<synchronous>, transform_indices = @transform_39, window_bounds = array<i64: 1, 1>}, {pipeline_mode = #tpu.pipeline_mode<synchronous>, transform_indices = @transform_40, window_bounds = array<i64: 1, 1>}, {pipeline_mode = #tpu.pipeline_mode<synchronous>, transform_indices = @transform_41, window_bounds = array<i64: 1, 1>}, {pipeline_mode = #tpu.pipeline_mode<synchronous>, transform_indices = @transform_42, window_bounds = array<i64: 1, 1>}, {pipeline_mode = #tpu.pipeline_mode<synchronous>, transform_indices = @transform_43, window_bounds = array<i64: 1, 1>}, {pipeline_mode = #tpu.pipeline_mode<synchronous>, transform_indices = @transform_44, window_bounds = array<i64: 1, 1>}, {pipeline_mode = #tpu.pipeline_mode<synchronous>, transform_indices = @transform_45, window_bounds = array<i64: 1, 1>}, {pipeline_mode = #tpu.pipeline_mode<synchronous>, transform_indices = @transform_46, window_bounds = array<i64: 1, 1>}, {pipeline_mode = #tpu.pipeline_mode<synchronous>, transform_indices = @transform_47, window_bounds = array<i64: 16, 16>}, {pipeline_mode = #tpu.pipeline_mode<synchronous>, transform_indices = @transform_48, window_bounds = array<i64: 1, 16>}, {pipeline_mode = #tpu.pipeline_mode<synchronous>, transform_indices = @transform_49, window_bounds = array<i64: 16, 16>}, {pipeline_mode = #tpu.pipeline_mode<synchronous>, transform_indices = @transform_50, window_bounds = array<i64: 1, 16>}, {pipeline_mode = #tpu.pipeline_mode<synchronous>, transform_indices = @transform_51, window_bounds = array<i64: 16, 16>}, {pipeline_mode = #tpu.pipeline_mode<synchronous>, transform_indices = @transform_52, window_bounds = array<i64: 1, 16>}, {pipeline_mode = #tpu.pipeline_mode<synchronous>, transform_indices = @transform_53, window_bounds = array<i64: 16, 30>}, {pipeline_mode = #tpu.pipeline_mode<synchronous>, transform_indices = @transform_54, window_bounds = array<i64: 4, 30>}, {pipeline_mode = #tpu.pipeline_mode<synchronous>, transform_indices = @transform_55, window_bounds = array<i64: 1, 30>}, {pipeline_mode = #tpu.pipeline_mode<synchronous>, transform_indices = @transform_56, window_bounds = array<i64: 30, 3>}, {pipeline_mode = #tpu.pipeline_mode<synchronous>, transform_indices = @transform_57, window_bounds = array<i64: 1, 3>}, {transform_indices = @transform_58, window_bounds = array<i64: 1, 1, 3>}]} {
    %c0 = arith.constant 0 : index
    %c0_0 = arith.constant 0 : index
    %0 = vector.load %arg15[%c0, %c0_0] : memref<16x20xf32, #tpu.memory_space<vmem>>, vector<16x20xf32>
    %c0_1 = arith.constant 0 : index
    %c0_2 = arith.constant 0 : index
    %1 = vector.load %arg16[%c0_1, %c0_2] : memref<16x20xf32, #tpu.memory_space<vmem>>, vector<16x20xf32>
    %c0_3 = arith.constant 0 : index
    %c0_4 = arith.constant 0 : index
    %2 = vector.load %arg17[%c0_3, %c0_4] : memref<8x20xf32, #tpu.memory_space<vmem>>, vector<8x20xf32>
    %c0_5 = arith.constant 0 : index
    %c0_6 = arith.constant 0 : index
    %3 = vector.load %arg18[%c0_5, %c0_6] : memref<1x20xf32, #tpu.memory_space<vmem>>, vector<1x20xf32>
    %c0_7 = arith.constant 0 : index
    %c0_8 = arith.constant 0 : index
    %4 = vector.load %arg19[%c0_7, %c0_8] : memref<20x16xf32, #tpu.memory_space<vmem>>, vector<20x16xf32>
    %c0_9 = arith.constant 0 : index
    %c0_10 = arith.constant 0 : index
    %5 = vector.load %arg20[%c0_9, %c0_10] : memref<1x16xf32, #tpu.memory_space<vmem>>, vector<1x16xf32>
    %c0_11 = arith.constant 0 : index
    %c0_12 = arith.constant 0 : index
    %6 = vector.load %arg21[%c0_11, %c0_12] : memref<16x24xf32, #tpu.memory_space<vmem>>, vector<16x24xf32>
    %c0_13 = arith.constant 0 : index
    %c0_14 = arith.constant 0 : index
    %7 = vector.load %arg22[%c0_13, %c0_14] : memref<16x24xf32, #tpu.memory_space<vmem>>, vector<16x24xf32>
    %c0_15 = arith.constant 0 : index
    %c0_16 = arith.constant 0 : index
    %8 = vector.load %arg23[%c0_15, %c0_16] : memref<1x24xf32, #tpu.memory_space<vmem>>, vector<1x24xf32>
    %c0_17 = arith.constant 0 : index
    %c0_18 = arith.constant 0 : index
    %9 = vector.load %arg24[%c0_17, %c0_18] : memref<24x16xf32, #tpu.memory_space<vmem>>, vector<24x16xf32>
    %c0_19 = arith.constant 0 : index
    %c0_20 = arith.constant 0 : index
    %10 = vector.load %arg25[%c0_19, %c0_20] : memref<1x16xf32, #tpu.memory_space<vmem>>, vector<1x16xf32>
    %c0_21 = arith.constant 0 : index
    %c0_22 = arith.constant 0 : index
    %11 = vector.load %arg26[%c0_21, %c0_22] : memref<8x8xf32, #tpu.memory_space<vmem>>, vector<8x8xf32>
    %c0_23 = arith.constant 0 : index
    %c0_24 = arith.constant 0 : index
    %12 = vector.load %arg27[%c0_23, %c0_24] : memref<8x8xf32, #tpu.memory_space<vmem>>, vector<8x8xf32>
    %c0_25 = arith.constant 0 : index
    %c0_26 = arith.constant 0 : index
    %13 = vector.load %arg28[%c0_25, %c0_26] : memref<1x8xf32, #tpu.memory_space<vmem>>, vector<1x8xf32>
    %c0_27 = arith.constant 0 : index
    %c0_28 = arith.constant 0 : index
    %14 = vector.load %arg29[%c0_27, %c0_28] : memref<1x8xf32, #tpu.memory_space<vmem>>, vector<1x8xf32>
    %c0_29 = arith.constant 0 : index
    %c0_30 = arith.constant 0 : index
    %15 = vector.load %arg30[%c0_29, %c0_30] : memref<8x8xf32, #tpu.memory_space<vmem>>, vector<8x8xf32>
    %c0_31 = arith.constant 0 : index
    %c0_32 = arith.constant 0 : index
    %16 = vector.load %arg31[%c0_31, %c0_32] : memref<1x8xf32, #tpu.memory_space<vmem>>, vector<1x8xf32>
    %c0_33 = arith.constant 0 : index
    %c0_34 = arith.constant 0 : index
    %17 = vector.load %arg32[%c0_33, %c0_34] : memref<8x12xf32, #tpu.memory_space<vmem>>, vector<8x12xf32>
    %c0_35 = arith.constant 0 : index
    %c0_36 = arith.constant 0 : index
    %18 = vector.load %arg33[%c0_35, %c0_36] : memref<8x12xf32, #tpu.memory_space<vmem>>, vector<8x12xf32>
    %c0_37 = arith.constant 0 : index
    %c0_38 = arith.constant 0 : index
    %19 = vector.load %arg34[%c0_37, %c0_38] : memref<1x12xf32, #tpu.memory_space<vmem>>, vector<1x12xf32>
    %c0_39 = arith.constant 0 : index
    %c0_40 = arith.constant 0 : index
    %20 = vector.load %arg35[%c0_39, %c0_40] : memref<12x8xf32, #tpu.memory_space<vmem>>, vector<12x8xf32>
    %c0_41 = arith.constant 0 : index
    %c0_42 = arith.constant 0 : index
    %21 = vector.load %arg36[%c0_41, %c0_42] : memref<1x8xf32, #tpu.memory_space<vmem>>, vector<1x8xf32>
    %c0_43 = arith.constant 0 : index
    %c0_44 = arith.constant 0 : index
    %22 = vector.load %arg37[%c0_43, %c0_44] : memref<1x1xf32, #tpu.memory_space<vmem>>, vector<1x1xf32>
    %c0_45 = arith.constant 0 : index
    %c0_46 = arith.constant 0 : index
    %23 = vector.load %arg38[%c0_45, %c0_46] : memref<1x1xf32, #tpu.memory_space<vmem>>, vector<1x1xf32>
    %c0_47 = arith.constant 0 : index
    %c0_48 = arith.constant 0 : index
    %24 = vector.load %arg39[%c0_47, %c0_48] : memref<1x1xf32, #tpu.memory_space<vmem>>, vector<1x1xf32>
    %c0_49 = arith.constant 0 : index
    %c0_50 = arith.constant 0 : index
    %25 = vector.load %arg40[%c0_49, %c0_50] : memref<1x1xf32, #tpu.memory_space<vmem>>, vector<1x1xf32>
    %c0_51 = arith.constant 0 : index
    %c0_52 = arith.constant 0 : index
    %26 = vector.load %arg41[%c0_51, %c0_52] : memref<1x1xf32, #tpu.memory_space<vmem>>, vector<1x1xf32>
    %c0_53 = arith.constant 0 : index
    %c0_54 = arith.constant 0 : index
    %27 = vector.load %arg42[%c0_53, %c0_54] : memref<1x1xf32, #tpu.memory_space<vmem>>, vector<1x1xf32>
    %c0_55 = arith.constant 0 : index
    %c0_56 = arith.constant 0 : index
    %28 = vector.load %arg43[%c0_55, %c0_56] : memref<1x1xf32, #tpu.memory_space<vmem>>, vector<1x1xf32>
    %c0_57 = arith.constant 0 : index
    %c0_58 = arith.constant 0 : index
    %29 = vector.load %arg44[%c0_57, %c0_58] : memref<1x1xf32, #tpu.memory_space<vmem>>, vector<1x1xf32>
    %c0_59 = arith.constant 0 : index
    %c0_60 = arith.constant 0 : index
    %30 = vector.load %arg45[%c0_59, %c0_60] : memref<1x1xf32, #tpu.memory_space<vmem>>, vector<1x1xf32>
    %c0_61 = arith.constant 0 : index
    %c0_62 = arith.constant 0 : index
    %31 = vector.load %arg46[%c0_61, %c0_62] : memref<1x1xf32, #tpu.memory_space<vmem>>, vector<1x1xf32>
    %c0_63 = arith.constant 0 : index
    %c0_64 = arith.constant 0 : index
    %32 = vector.load %arg47[%c0_63, %c0_64] : memref<1x1xf32, #tpu.memory_space<vmem>>, vector<1x1xf32>
    %c0_65 = arith.constant 0 : index
    %c0_66 = arith.constant 0 : index
    %33 = vector.load %arg48[%c0_65, %c0_66] : memref<16x16xf32, #tpu.memory_space<vmem>>, vector<16x16xf32>
    %c0_67 = arith.constant 0 : index
    %c0_68 = arith.constant 0 : index
    %34 = vector.load %arg49[%c0_67, %c0_68] : memref<1x16xf32, #tpu.memory_space<vmem>>, vector<1x16xf32>
    %c0_69 = arith.constant 0 : index
    %c0_70 = arith.constant 0 : index
    %35 = vector.load %arg50[%c0_69, %c0_70] : memref<16x16xf32, #tpu.memory_space<vmem>>, vector<16x16xf32>
    %c0_71 = arith.constant 0 : index
    %c0_72 = arith.constant 0 : index
    %36 = vector.load %arg51[%c0_71, %c0_72] : memref<1x16xf32, #tpu.memory_space<vmem>>, vector<1x16xf32>
    %c0_73 = arith.constant 0 : index
    %c0_74 = arith.constant 0 : index
    %37 = vector.load %arg52[%c0_73, %c0_74] : memref<16x16xf32, #tpu.memory_space<vmem>>, vector<16x16xf32>
    %c0_75 = arith.constant 0 : index
    %c0_76 = arith.constant 0 : index
    %38 = vector.load %arg53[%c0_75, %c0_76] : memref<1x16xf32, #tpu.memory_space<vmem>>, vector<1x16xf32>
    %c0_77 = arith.constant 0 : index
    %c0_78 = arith.constant 0 : index
    %39 = vector.load %arg54[%c0_77, %c0_78] : memref<16x30xf32, #tpu.memory_space<vmem>>, vector<16x30xf32>
    %c0_79 = arith.constant 0 : index
    %c0_80 = arith.constant 0 : index
    %40 = vector.load %arg55[%c0_79, %c0_80] : memref<4x30xf32, #tpu.memory_space<vmem>>, vector<4x30xf32>
    %c0_81 = arith.constant 0 : index
    %c0_82 = arith.constant 0 : index
    %41 = vector.load %arg56[%c0_81, %c0_82] : memref<1x30xf32, #tpu.memory_space<vmem>>, vector<1x30xf32>
    %c0_83 = arith.constant 0 : index
    %c0_84 = arith.constant 0 : index
    %42 = vector.load %arg57[%c0_83, %c0_84] : memref<30x3xf32, #tpu.memory_space<vmem>>, vector<30x3xf32>
    %c0_85 = arith.constant 0 : index
    %c0_86 = arith.constant 0 : index
    %43 = vector.load %arg58[%c0_85, %c0_86] : memref<1x3xf32, #tpu.memory_space<vmem>>, vector<1x3xf32>
    %c0_87 = arith.constant 0 : index
    %c0_88 = arith.constant 0 : index
    %c0_89 = arith.constant 0 : index
    %44 = vector.load %arg1[%c0_87, %c0_88, %c0_89] : memref<1x10x16xf32, #tpu.memory_space<vmem>>, vector<1x10x16xf32>
    %45 = vector.shape_cast %44 : vector<1x10x16xf32> to vector<10x16xf32>
    %c0_90 = arith.constant 0 : index
    %c0_91 = arith.constant 0 : index
    %c0_92 = arith.constant 0 : index
    %46 = vector.load %arg2[%c0_90, %c0_91, %c0_92] : memref<1x12x8xf32, #tpu.memory_space<vmem>>, vector<1x12x8xf32>
    %47 = vector.shape_cast %46 : vector<1x12x8xf32> to vector<12x8xf32>
    %c0_93 = arith.constant 0 : index
    %c0_94 = arith.constant 0 : index
    %c0_95 = arith.constant 0 : index
    %48 = vector.load %arg3[%c0_93, %c0_94, %c0_95] : memref<1x14x1xf32, #tpu.memory_space<vmem>>, vector<1x14x1xf32>
    %49 = vector.shape_cast %48 : vector<1x14x1xf32> to vector<14x1xf32>
    %c0_96 = arith.constant 0 : index
    %c0_97 = arith.constant 0 : index
    %c0_98 = arith.constant 0 : index
    %50 = vector.load %arg6[%c0_96, %c0_97, %c0_98] : memref<1x12x1xi32, #tpu.memory_space<vmem>>, vector<1x12x1xi32>
    %51 = vector.shape_cast %50 : vector<1x12x1xi32> to vector<12x1xi32>
    %c0_99 = arith.constant 0 : index
    %c0_100 = arith.constant 0 : index
    %c0_101 = arith.constant 0 : index
    %52 = vector.load %arg7[%c0_99, %c0_100, %c0_101] : memref<1x12x1xi32, #tpu.memory_space<vmem>>, vector<1x12x1xi32>
    %53 = vector.shape_cast %52 : vector<1x12x1xi32> to vector<12x1xi32>
    %c0_102 = arith.constant 0 : index
    %c0_103 = arith.constant 0 : index
    %c0_104 = arith.constant 0 : index
    %54 = vector.load %arg8[%c0_102, %c0_103, %c0_104] : memref<1x1x12xi32, #tpu.memory_space<vmem>>, vector<1x1x12xi32>
    %55 = vector.shape_cast %54 : vector<1x1x12xi32> to vector<1x12xi32>
    %56 = tpu.iota {dimensions = array<i32: 1>} : vector<12x10xi32>
    %57 = vector.broadcast %51 : vector<12x1xi32> to vector<12x10xi32>
    %58 = arith.cmpi eq, %57, %56 : vector<12x10xi32>
    %cst = arith.constant 1.000000e+00 : f32
    %cst_105 = arith.constant 0.000000e+00 : f32
    %59 = vector.broadcast %cst : f32 to vector<12x10xf32>
    %60 = vector.broadcast %cst_105 : f32 to vector<12x10xf32>
    %61 = arith.select %58, %59, %60 : vector<12x10xi1>, vector<12x10xf32>
    %62 = vector.broadcast %53 : vector<12x1xi32> to vector<12x10xi32>
    %63 = arith.cmpi eq, %62, %56 : vector<12x10xi32>
    %cst_106 = arith.constant 1.000000e+00 : f32
    %cst_107 = arith.constant 0.000000e+00 : f32
    %64 = vector.broadcast %cst_106 : f32 to vector<12x10xf32>
    %65 = vector.broadcast %cst_107 : f32 to vector<12x10xf32>
    %66 = arith.select %63, %64, %65 : vector<12x10xi1>, vector<12x10xf32>
    %67 = tpu.iota {dimensions = array<i32: 0>} : vector<10x12xi32>
    %68 = vector.broadcast %55 : vector<1x12xi32> to vector<10x12xi32>
    %69 = arith.cmpi eq, %68, %67 : vector<10x12xi32>
    %cst_108 = arith.constant 1.000000e+00 : f32
    %cst_109 = arith.constant 0.000000e+00 : f32
    %70 = vector.broadcast %cst_108 : f32 to vector<10x12xf32>
    %71 = vector.broadcast %cst_109 : f32 to vector<10x12xf32>
    %72 = arith.select %69, %70, %71 : vector<10x12xi1>, vector<10x12xf32>
    %c0_110 = arith.constant 0 : index
    %c0_111 = arith.constant 0 : index
    %c0_112 = arith.constant 0 : index
    %73 = vector.load %arg9[%c0_110, %c0_111, %c0_112] : memref<1x14x1xi32, #tpu.memory_space<vmem>>, vector<1x14x1xi32>
    %74 = vector.shape_cast %73 : vector<1x14x1xi32> to vector<14x1xi32>
    %c0_113 = arith.constant 0 : index
    %c0_114 = arith.constant 0 : index
    %c0_115 = arith.constant 0 : index
    %75 = vector.load %arg10[%c0_113, %c0_114, %c0_115] : memref<1x14x1xi32, #tpu.memory_space<vmem>>, vector<1x14x1xi32>
    %76 = vector.shape_cast %75 : vector<1x14x1xi32> to vector<14x1xi32>
    %c0_116 = arith.constant 0 : index
    %c0_117 = arith.constant 0 : index
    %c0_118 = arith.constant 0 : index
    %77 = vector.load %arg11[%c0_116, %c0_117, %c0_118] : memref<1x1x14xi32, #tpu.memory_space<vmem>>, vector<1x1x14xi32>
    %78 = vector.shape_cast %77 : vector<1x1x14xi32> to vector<1x14xi32>
    %79 = tpu.iota {dimensions = array<i32: 1>} : vector<14x12xi32>
    %80 = vector.broadcast %74 : vector<14x1xi32> to vector<14x12xi32>
    %81 = arith.cmpi eq, %80, %79 : vector<14x12xi32>
    %cst_119 = arith.constant 1.000000e+00 : f32
    %cst_120 = arith.constant 0.000000e+00 : f32
    %82 = vector.broadcast %cst_119 : f32 to vector<14x12xf32>
    %83 = vector.broadcast %cst_120 : f32 to vector<14x12xf32>
    %84 = arith.select %81, %82, %83 : vector<14x12xi1>, vector<14x12xf32>
    %85 = vector.broadcast %76 : vector<14x1xi32> to vector<14x12xi32>
    %86 = arith.cmpi eq, %85, %79 : vector<14x12xi32>
    %cst_121 = arith.constant 1.000000e+00 : f32
    %cst_122 = arith.constant 0.000000e+00 : f32
    %87 = vector.broadcast %cst_121 : f32 to vector<14x12xf32>
    %88 = vector.broadcast %cst_122 : f32 to vector<14x12xf32>
    %89 = arith.select %86, %87, %88 : vector<14x12xi1>, vector<14x12xf32>
    %90 = tpu.iota {dimensions = array<i32: 0>} : vector<12x14xi32>
    %91 = vector.broadcast %78 : vector<1x14xi32> to vector<12x14xi32>
    %92 = arith.cmpi eq, %91, %90 : vector<12x14xi32>
    %cst_123 = arith.constant 1.000000e+00 : f32
    %cst_124 = arith.constant 0.000000e+00 : f32
    %93 = vector.broadcast %cst_123 : f32 to vector<12x14xf32>
    %94 = vector.broadcast %cst_124 : f32 to vector<12x14xf32>
    %95 = arith.select %92, %93, %94 : vector<12x14xi1>, vector<12x14xf32>
    %c0_125 = arith.constant 0 : index
    %c0_126 = arith.constant 0 : index
    %c0_127 = arith.constant 0 : index
    %96 = vector.load %arg5[%c0_125, %c0_126, %c0_127] : memref<1x6x1xf32, #tpu.memory_space<vmem>>, vector<1x6x1xf32>
    %97 = vector.shape_cast %96 : vector<1x6x1xf32> to vector<6x1xf32>
    %c0_128 = arith.constant 0 : index
    %c0_129 = arith.constant 0 : index
    %c0_130 = arith.constant 0 : index
    %98 = vector.load %arg12[%c0_128, %c0_129, %c0_130] : memref<1x6x1xi32, #tpu.memory_space<vmem>>, vector<1x6x1xi32>
    %99 = vector.shape_cast %98 : vector<1x6x1xi32> to vector<6x1xi32>
    %c0_131 = arith.constant 0 : index
    %c0_132 = arith.constant 0 : index
    %c0_133 = arith.constant 0 : index
    %100 = vector.load %arg13[%c0_131, %c0_132, %c0_133] : memref<1x6x1xi32, #tpu.memory_space<vmem>>, vector<1x6x1xi32>
    %101 = vector.shape_cast %100 : vector<1x6x1xi32> to vector<6x1xi32>
    %c0_134 = arith.constant 0 : index
    %c0_135 = arith.constant 0 : index
    %c0_136 = arith.constant 0 : index
    %102 = vector.load %arg14[%c0_134, %c0_135, %c0_136] : memref<1x1x6xi32, #tpu.memory_space<vmem>>, vector<1x1x6xi32>
    %103 = vector.shape_cast %102 : vector<1x1x6xi32> to vector<1x6xi32>
    %104 = tpu.iota {dimensions = array<i32: 1>} : vector<6x14xi32>
    %105 = vector.broadcast %99 : vector<6x1xi32> to vector<6x14xi32>
    %106 = arith.cmpi eq, %105, %104 : vector<6x14xi32>
    %cst_137 = arith.constant 1.000000e+00 : f32
    %cst_138 = arith.constant 0.000000e+00 : f32
    %107 = vector.broadcast %cst_137 : f32 to vector<6x14xf32>
    %108 = vector.broadcast %cst_138 : f32 to vector<6x14xf32>
    %109 = arith.select %106, %107, %108 : vector<6x14xi1>, vector<6x14xf32>
    %110 = vector.broadcast %101 : vector<6x1xi32> to vector<6x14xi32>
    %111 = arith.cmpi eq, %110, %104 : vector<6x14xi32>
    %cst_139 = arith.constant 1.000000e+00 : f32
    %cst_140 = arith.constant 0.000000e+00 : f32
    %112 = vector.broadcast %cst_139 : f32 to vector<6x14xf32>
    %113 = vector.broadcast %cst_140 : f32 to vector<6x14xf32>
    %114 = arith.select %111, %112, %113 : vector<6x14xi1>, vector<6x14xf32>
    %115 = tpu.iota {dimensions = array<i32: 0>} : vector<14x6xi32>
    %116 = vector.broadcast %103 : vector<1x6xi32> to vector<14x6xi32>
    %117 = arith.cmpi eq, %116, %115 : vector<14x6xi32>
    %cst_141 = arith.constant 1.000000e+00 : f32
    %cst_142 = arith.constant 0.000000e+00 : f32
    %118 = vector.broadcast %cst_141 : f32 to vector<14x6xf32>
    %119 = vector.broadcast %cst_142 : f32 to vector<14x6xf32>
    %120 = arith.select %117, %118, %119 : vector<14x6xi1>, vector<14x6xf32>
    %c0_i32 = arith.constant 0 : i32
    %c3_i32 = arith.constant 3 : i32
    %121 = arith.addi %c0_i32, %c3_i32 : i32
    %c1_i32 = arith.constant 1 : i32
    %122:3 = scf.for %arg60 = %c0_i32 to %121 step %c1_i32 iter_args(%arg61 = %45, %arg62 = %47, %arg63 = %49) -> (vector<10x16xf32>, vector<12x8xf32>, vector<14x1xf32>)  : i32 {
      %cst_161 = arith.constant dense<0.000000e+00> : vector<6x1xf32>
      %164 = tpu.matmul %109, %arg63, %cst_161 {dimension_numbers = #tpu.dot_dimension_numbers<[1], [0], [0], [1], [0, 0, 1, 1], [], []>} : vector<6x14xf32>, vector<14x1xf32>, vector<6x1xf32> -> vector<6x1xf32>
      %cst_162 = arith.constant dense<0.000000e+00> : vector<6x1xf32>
      %165 = tpu.matmul %114, %arg63, %cst_162 {dimension_numbers = #tpu.dot_dimension_numbers<[1], [0], [0], [1], [0, 0, 1, 1], [], []>} : vector<6x14xf32>, vector<14x1xf32>, vector<6x1xf32> -> vector<6x1xf32>
      %166 = vector.broadcast %22 : vector<1x1xf32> to vector<6x1xf32>
      %167 = arith.mulf %164, %166 : vector<6x1xf32>
      %168 = vector.broadcast %23 : vector<1x1xf32> to vector<6x1xf32>
      %169 = arith.mulf %165, %168 : vector<6x1xf32>
      %170 = arith.addf %167, %169 : vector<6x1xf32>
      %171 = vector.broadcast %24 : vector<1x1xf32> to vector<6x1xf32>
      %172 = arith.mulf %97, %171 : vector<6x1xf32>
      %173 = arith.addf %170, %172 : vector<6x1xf32>
      %174 = vector.broadcast %25 : vector<1x1xf32> to vector<6x1xf32>
      %175 = arith.addf %173, %174 : vector<6x1xf32>
      %cst_163 = arith.constant 5.000000e-01 : f32
      %176 = vector.broadcast %cst_163 : f32 to vector<6x1xf32>
      %177 = arith.mulf %176, %175 : vector<6x1xf32>
      %cst_164 = arith.constant 0.707106769 : f32
      %178 = vector.broadcast %cst_164 : f32 to vector<6x1xf32>
      %179 = arith.mulf %175, %178 : vector<6x1xf32>
      %180 = math.erf %179 : vector<6x1xf32>
      %cst_165 = arith.constant 1.000000e+00 : f32
      %181 = vector.broadcast %cst_165 : f32 to vector<6x1xf32>
      %182 = arith.addf %181, %180 : vector<6x1xf32>
      %183 = arith.mulf %177, %182 : vector<6x1xf32>
      %184 = vector.broadcast %26 : vector<1x1xf32> to vector<6x1xf32>
      %185 = arith.mulf %183, %184 : vector<6x1xf32>
      %186 = vector.broadcast %27 : vector<1x1xf32> to vector<6x1xf32>
      %187 = arith.addf %185, %186 : vector<6x1xf32>
      %cst_166 = arith.constant 5.000000e-01 : f32
      %188 = vector.broadcast %cst_166 : f32 to vector<6x1xf32>
      %189 = arith.mulf %188, %187 : vector<6x1xf32>
      %cst_167 = arith.constant 0.707106769 : f32
      %190 = vector.broadcast %cst_167 : f32 to vector<6x1xf32>
      %191 = arith.mulf %187, %190 : vector<6x1xf32>
      %192 = math.erf %191 : vector<6x1xf32>
      %cst_168 = arith.constant 1.000000e+00 : f32
      %193 = vector.broadcast %cst_168 : f32 to vector<6x1xf32>
      %194 = arith.addf %193, %192 : vector<6x1xf32>
      %195 = arith.mulf %189, %194 : vector<6x1xf32>
      %cst_169 = arith.constant dense<0.000000e+00> : vector<14x1xf32>
      %196 = tpu.matmul %120, %195, %cst_169 {dimension_numbers = #tpu.dot_dimension_numbers<[1], [0], [0], [1], [0, 0, 1, 1], [], []>} : vector<14x6xf32>, vector<6x1xf32>, vector<14x1xf32> -> vector<14x1xf32>
      %197 = vector.broadcast %28 : vector<1x1xf32> to vector<14x1xf32>
      %198 = arith.mulf %arg63, %197 : vector<14x1xf32>
      %199 = vector.broadcast %29 : vector<1x1xf32> to vector<14x1xf32>
      %200 = arith.mulf %196, %199 : vector<14x1xf32>
      %201 = arith.addf %198, %200 : vector<14x1xf32>
      %202 = vector.broadcast %30 : vector<1x1xf32> to vector<14x1xf32>
      %203 = arith.addf %201, %202 : vector<14x1xf32>
      %cst_170 = arith.constant 5.000000e-01 : f32
      %204 = vector.broadcast %cst_170 : f32 to vector<14x1xf32>
      %205 = arith.mulf %204, %203 : vector<14x1xf32>
      %cst_171 = arith.constant 0.707106769 : f32
      %206 = vector.broadcast %cst_171 : f32 to vector<14x1xf32>
      %207 = arith.mulf %203, %206 : vector<14x1xf32>
      %208 = math.erf %207 : vector<14x1xf32>
      %cst_172 = arith.constant 1.000000e+00 : f32
      %209 = vector.broadcast %cst_172 : f32 to vector<14x1xf32>
      %210 = arith.addf %209, %208 : vector<14x1xf32>
      %211 = arith.mulf %205, %210 : vector<14x1xf32>
      %212 = vector.broadcast %31 : vector<1x1xf32> to vector<14x1xf32>
      %213 = arith.mulf %211, %212 : vector<14x1xf32>
      %214 = vector.broadcast %32 : vector<1x1xf32> to vector<14x1xf32>
      %215 = arith.addf %213, %214 : vector<14x1xf32>
      %cst_173 = arith.constant 5.000000e-01 : f32
      %216 = vector.broadcast %cst_173 : f32 to vector<14x1xf32>
      %217 = arith.mulf %216, %215 : vector<14x1xf32>
      %cst_174 = arith.constant 0.707106769 : f32
      %218 = vector.broadcast %cst_174 : f32 to vector<14x1xf32>
      %219 = arith.mulf %215, %218 : vector<14x1xf32>
      %220 = math.erf %219 : vector<14x1xf32>
      %cst_175 = arith.constant 1.000000e+00 : f32
      %221 = vector.broadcast %cst_175 : f32 to vector<14x1xf32>
      %222 = arith.addf %221, %220 : vector<14x1xf32>
      %223 = arith.mulf %217, %222 : vector<14x1xf32>
      %224 = arith.addf %arg63, %223 : vector<14x1xf32>
      %cst_176 = arith.constant dense<0.000000e+00> : vector<14x8xf32>
      %225 = tpu.matmul %84, %arg62, %cst_176 {dimension_numbers = #tpu.dot_dimension_numbers<[1], [0], [0], [1], [0, 0, 1, 1], [], []>} : vector<14x12xf32>, vector<12x8xf32>, vector<14x8xf32> -> vector<14x8xf32>
      %cst_177 = arith.constant dense<0.000000e+00> : vector<14x8xf32>
      %226 = tpu.matmul %89, %arg62, %cst_177 {dimension_numbers = #tpu.dot_dimension_numbers<[1], [0], [0], [1], [0, 0, 1, 1], [], []>} : vector<14x12xf32>, vector<12x8xf32>, vector<14x8xf32> -> vector<14x8xf32>
      %cst_178 = arith.constant dense<0.000000e+00> : vector<14x8xf32>
      %227 = tpu.matmul %225, %11, %cst_178 {dimension_numbers = #tpu.dot_dimension_numbers<[1], [0], [0], [1], [0, 0, 1, 1], [], []>} : vector<14x8xf32>, vector<8x8xf32>, vector<14x8xf32> -> vector<14x8xf32>
      %cst_179 = arith.constant dense<0.000000e+00> : vector<14x8xf32>
      %228 = tpu.matmul %226, %12, %cst_179 {dimension_numbers = #tpu.dot_dimension_numbers<[1], [0], [0], [1], [0, 0, 1, 1], [], []>} : vector<14x8xf32>, vector<8x8xf32>, vector<14x8xf32> -> vector<14x8xf32>
      %229 = arith.addf %227, %228 : vector<14x8xf32>
      %230 = vector.broadcast %224 : vector<14x1xf32> to vector<14x8xf32>
      %231 = vector.broadcast %13 : vector<1x8xf32> to vector<14x8xf32>
      %232 = arith.mulf %230, %231 : vector<14x8xf32>
      %233 = arith.addf %229, %232 : vector<14x8xf32>
      %234 = vector.broadcast %14 : vector<1x8xf32> to vector<14x8xf32>
      %235 = arith.addf %233, %234 : vector<14x8xf32>
      %cst_180 = arith.constant 5.000000e-01 : f32
      %236 = vector.broadcast %cst_180 : f32 to vector<14x8xf32>
      %237 = arith.mulf %236, %235 : vector<14x8xf32>
      %cst_181 = arith.constant 0.707106769 : f32
      %238 = vector.broadcast %cst_181 : f32 to vector<14x8xf32>
      %239 = arith.mulf %235, %238 : vector<14x8xf32>
      %240 = math.erf %239 : vector<14x8xf32>
      %cst_182 = arith.constant 1.000000e+00 : f32
      %241 = vector.broadcast %cst_182 : f32 to vector<14x8xf32>
      %242 = arith.addf %241, %240 : vector<14x8xf32>
      %243 = arith.mulf %237, %242 : vector<14x8xf32>
      %cst_183 = arith.constant dense<0.000000e+00> : vector<14x8xf32>
      %244 = tpu.matmul %243, %15, %cst_183 {dimension_numbers = #tpu.dot_dimension_numbers<[1], [0], [0], [1], [0, 0, 1, 1], [], []>} : vector<14x8xf32>, vector<8x8xf32>, vector<14x8xf32> -> vector<14x8xf32>
      %245 = vector.broadcast %16 : vector<1x8xf32> to vector<14x8xf32>
      %246 = arith.addf %244, %245 : vector<14x8xf32>
      %cst_184 = arith.constant 5.000000e-01 : f32
      %247 = vector.broadcast %cst_184 : f32 to vector<14x8xf32>
      %248 = arith.mulf %247, %246 : vector<14x8xf32>
      %cst_185 = arith.constant 0.707106769 : f32
      %249 = vector.broadcast %cst_185 : f32 to vector<14x8xf32>
      %250 = arith.mulf %246, %249 : vector<14x8xf32>
      %251 = math.erf %250 : vector<14x8xf32>
      %cst_186 = arith.constant 1.000000e+00 : f32
      %252 = vector.broadcast %cst_186 : f32 to vector<14x8xf32>
      %253 = arith.addf %252, %251 : vector<14x8xf32>
      %254 = arith.mulf %248, %253 : vector<14x8xf32>
      %cst_187 = arith.constant dense<0.000000e+00> : vector<12x8xf32>
      %255 = tpu.matmul %95, %254, %cst_187 {dimension_numbers = #tpu.dot_dimension_numbers<[1], [0], [0], [1], [0, 0, 1, 1], [], []>} : vector<12x14xf32>, vector<14x8xf32>, vector<12x8xf32> -> vector<12x8xf32>
      %cst_188 = arith.constant dense<0.000000e+00> : vector<12x12xf32>
      %256 = tpu.matmul %arg62, %17, %cst_188 {dimension_numbers = #tpu.dot_dimension_numbers<[1], [0], [0], [1], [0, 0, 1, 1], [], []>} : vector<12x8xf32>, vector<8x12xf32>, vector<12x12xf32> -> vector<12x12xf32>
      %cst_189 = arith.constant dense<0.000000e+00> : vector<12x12xf32>
      %257 = tpu.matmul %255, %18, %cst_189 {dimension_numbers = #tpu.dot_dimension_numbers<[1], [0], [0], [1], [0, 0, 1, 1], [], []>} : vector<12x8xf32>, vector<8x12xf32>, vector<12x12xf32> -> vector<12x12xf32>
      %258 = arith.addf %256, %257 : vector<12x12xf32>
      %259 = vector.broadcast %19 : vector<1x12xf32> to vector<12x12xf32>
      %260 = arith.addf %258, %259 : vector<12x12xf32>
      %cst_190 = arith.constant 5.000000e-01 : f32
      %261 = vector.broadcast %cst_190 : f32 to vector<12x12xf32>
      %262 = arith.mulf %261, %260 : vector<12x12xf32>
      %cst_191 = arith.constant 0.707106769 : f32
      %263 = vector.broadcast %cst_191 : f32 to vector<12x12xf32>
      %264 = arith.mulf %260, %263 : vector<12x12xf32>
      %265 = math.erf %264 : vector<12x12xf32>
      %cst_192 = arith.constant 1.000000e+00 : f32
      %266 = vector.broadcast %cst_192 : f32 to vector<12x12xf32>
      %267 = arith.addf %266, %265 : vector<12x12xf32>
      %268 = arith.mulf %262, %267 : vector<12x12xf32>
      %cst_193 = arith.constant dense<0.000000e+00> : vector<12x8xf32>
      %269 = tpu.matmul %268, %20, %cst_193 {dimension_numbers = #tpu.dot_dimension_numbers<[1], [0], [0], [1], [0, 0, 1, 1], [], []>} : vector<12x12xf32>, vector<12x8xf32>, vector<12x8xf32> -> vector<12x8xf32>
      %270 = vector.broadcast %21 : vector<1x8xf32> to vector<12x8xf32>
      %271 = arith.addf %269, %270 : vector<12x8xf32>
      %cst_194 = arith.constant 5.000000e-01 : f32
      %272 = vector.broadcast %cst_194 : f32 to vector<12x8xf32>
      %273 = arith.mulf %272, %271 : vector<12x8xf32>
      %cst_195 = arith.constant 0.707106769 : f32
      %274 = vector.broadcast %cst_195 : f32 to vector<12x8xf32>
      %275 = arith.mulf %271, %274 : vector<12x8xf32>
      %276 = math.erf %275 : vector<12x8xf32>
      %cst_196 = arith.constant 1.000000e+00 : f32
      %277 = vector.broadcast %cst_196 : f32 to vector<12x8xf32>
      %278 = arith.addf %277, %276 : vector<12x8xf32>
      %279 = arith.mulf %273, %278 : vector<12x8xf32>
      %280 = arith.addf %arg62, %279 : vector<12x8xf32>
      %cst_197 = arith.constant dense<0.000000e+00> : vector<12x16xf32>
      %281 = tpu.matmul %61, %arg61, %cst_197 {dimension_numbers = #tpu.dot_dimension_numbers<[1], [0], [0], [1], [0, 0, 1, 1], [], []>} : vector<12x10xf32>, vector<10x16xf32>, vector<12x16xf32> -> vector<12x16xf32>
      %cst_198 = arith.constant dense<0.000000e+00> : vector<12x16xf32>
      %282 = tpu.matmul %66, %arg61, %cst_198 {dimension_numbers = #tpu.dot_dimension_numbers<[1], [0], [0], [1], [0, 0, 1, 1], [], []>} : vector<12x10xf32>, vector<10x16xf32>, vector<12x16xf32> -> vector<12x16xf32>
      %cst_199 = arith.constant dense<0.000000e+00> : vector<12x20xf32>
      %283 = tpu.matmul %281, %0, %cst_199 {dimension_numbers = #tpu.dot_dimension_numbers<[1], [0], [0], [1], [0, 0, 1, 1], [], []>} : vector<12x16xf32>, vector<16x20xf32>, vector<12x20xf32> -> vector<12x20xf32>
      %cst_200 = arith.constant dense<0.000000e+00> : vector<12x20xf32>
      %284 = tpu.matmul %282, %1, %cst_200 {dimension_numbers = #tpu.dot_dimension_numbers<[1], [0], [0], [1], [0, 0, 1, 1], [], []>} : vector<12x16xf32>, vector<16x20xf32>, vector<12x20xf32> -> vector<12x20xf32>
      %285 = arith.addf %283, %284 : vector<12x20xf32>
      %cst_201 = arith.constant dense<0.000000e+00> : vector<12x20xf32>
      %286 = tpu.matmul %280, %2, %cst_201 {dimension_numbers = #tpu.dot_dimension_numbers<[1], [0], [0], [1], [0, 0, 1, 1], [], []>} : vector<12x8xf32>, vector<8x20xf32>, vector<12x20xf32> -> vector<12x20xf32>
      %287 = arith.addf %285, %286 : vector<12x20xf32>
      %288 = vector.broadcast %3 : vector<1x20xf32> to vector<12x20xf32>
      %289 = arith.addf %287, %288 : vector<12x20xf32>
      %cst_202 = arith.constant 5.000000e-01 : f32
      %290 = vector.broadcast %cst_202 : f32 to vector<12x20xf32>
      %291 = arith.mulf %290, %289 : vector<12x20xf32>
      %cst_203 = arith.constant 0.707106769 : f32
      %292 = vector.broadcast %cst_203 : f32 to vector<12x20xf32>
      %293 = arith.mulf %289, %292 : vector<12x20xf32>
      %294 = math.erf %293 : vector<12x20xf32>
      %cst_204 = arith.constant 1.000000e+00 : f32
      %295 = vector.broadcast %cst_204 : f32 to vector<12x20xf32>
      %296 = arith.addf %295, %294 : vector<12x20xf32>
      %297 = arith.mulf %291, %296 : vector<12x20xf32>
      %cst_205 = arith.constant dense<0.000000e+00> : vector<12x16xf32>
      %298 = tpu.matmul %297, %4, %cst_205 {dimension_numbers = #tpu.dot_dimension_numbers<[1], [0], [0], [1], [0, 0, 1, 1], [], []>} : vector<12x20xf32>, vector<20x16xf32>, vector<12x16xf32> -> vector<12x16xf32>
      %299 = vector.broadcast %5 : vector<1x16xf32> to vector<12x16xf32>
      %300 = arith.addf %298, %299 : vector<12x16xf32>
      %cst_206 = arith.constant 5.000000e-01 : f32
      %301 = vector.broadcast %cst_206 : f32 to vector<12x16xf32>
      %302 = arith.mulf %301, %300 : vector<12x16xf32>
      %cst_207 = arith.constant 0.707106769 : f32
      %303 = vector.broadcast %cst_207 : f32 to vector<12x16xf32>
      %304 = arith.mulf %300, %303 : vector<12x16xf32>
      %305 = math.erf %304 : vector<12x16xf32>
      %cst_208 = arith.constant 1.000000e+00 : f32
      %306 = vector.broadcast %cst_208 : f32 to vector<12x16xf32>
      %307 = arith.addf %306, %305 : vector<12x16xf32>
      %308 = arith.mulf %302, %307 : vector<12x16xf32>
      %cst_209 = arith.constant dense<0.000000e+00> : vector<10x16xf32>
      %309 = tpu.matmul %72, %308, %cst_209 {dimension_numbers = #tpu.dot_dimension_numbers<[1], [0], [0], [1], [0, 0, 1, 1], [], []>} : vector<10x12xf32>, vector<12x16xf32>, vector<10x16xf32> -> vector<10x16xf32>
      %cst_210 = arith.constant dense<0.000000e+00> : vector<10x24xf32>
      %310 = tpu.matmul %arg61, %6, %cst_210 {dimension_numbers = #tpu.dot_dimension_numbers<[1], [0], [0], [1], [0, 0, 1, 1], [], []>} : vector<10x16xf32>, vector<16x24xf32>, vector<10x24xf32> -> vector<10x24xf32>
      %cst_211 = arith.constant dense<0.000000e+00> : vector<10x24xf32>
      %311 = tpu.matmul %309, %7, %cst_211 {dimension_numbers = #tpu.dot_dimension_numbers<[1], [0], [0], [1], [0, 0, 1, 1], [], []>} : vector<10x16xf32>, vector<16x24xf32>, vector<10x24xf32> -> vector<10x24xf32>
      %312 = arith.addf %310, %311 : vector<10x24xf32>
      %313 = vector.broadcast %8 : vector<1x24xf32> to vector<10x24xf32>
      %314 = arith.addf %312, %313 : vector<10x24xf32>
      %cst_212 = arith.constant 5.000000e-01 : f32
      %315 = vector.broadcast %cst_212 : f32 to vector<10x24xf32>
      %316 = arith.mulf %315, %314 : vector<10x24xf32>
      %cst_213 = arith.constant 0.707106769 : f32
      %317 = vector.broadcast %cst_213 : f32 to vector<10x24xf32>
      %318 = arith.mulf %314, %317 : vector<10x24xf32>
      %319 = math.erf %318 : vector<10x24xf32>
      %cst_214 = arith.constant 1.000000e+00 : f32
      %320 = vector.broadcast %cst_214 : f32 to vector<10x24xf32>
      %321 = arith.addf %320, %319 : vector<10x24xf32>
      %322 = arith.mulf %316, %321 : vector<10x24xf32>
      %cst_215 = arith.constant dense<0.000000e+00> : vector<10x16xf32>
      %323 = tpu.matmul %322, %9, %cst_215 {dimension_numbers = #tpu.dot_dimension_numbers<[1], [0], [0], [1], [0, 0, 1, 1], [], []>} : vector<10x24xf32>, vector<24x16xf32>, vector<10x16xf32> -> vector<10x16xf32>
      %324 = vector.broadcast %10 : vector<1x16xf32> to vector<10x16xf32>
      %325 = arith.addf %323, %324 : vector<10x16xf32>
      %cst_216 = arith.constant 5.000000e-01 : f32
      %326 = vector.broadcast %cst_216 : f32 to vector<10x16xf32>
      %327 = arith.mulf %326, %325 : vector<10x16xf32>
      %cst_217 = arith.constant 0.707106769 : f32
      %328 = vector.broadcast %cst_217 : f32 to vector<10x16xf32>
      %329 = arith.mulf %325, %328 : vector<10x16xf32>
      %330 = math.erf %329 : vector<10x16xf32>
      %cst_218 = arith.constant 1.000000e+00 : f32
      %331 = vector.broadcast %cst_218 : f32 to vector<10x16xf32>
      %332 = arith.addf %331, %330 : vector<10x16xf32>
      %333 = arith.mulf %327, %332 : vector<10x16xf32>
      %334 = arith.addf %arg61, %333 : vector<10x16xf32>
      scf.yield %334, %280, %224 : vector<10x16xf32>, vector<12x8xf32>, vector<14x1xf32>
    }
    %cst_143 = arith.constant dense<0.000000e+00> : vector<10x16xf32>
    %123 = tpu.matmul %122#0, %33, %cst_143 {dimension_numbers = #tpu.dot_dimension_numbers<[1], [0], [0], [1], [0, 0, 1, 1], [], []>} : vector<10x16xf32>, vector<16x16xf32>, vector<10x16xf32> -> vector<10x16xf32>
    %124 = vector.broadcast %34 : vector<1x16xf32> to vector<10x16xf32>
    %125 = arith.addf %123, %124 : vector<10x16xf32>
    %cst_144 = arith.constant dense<0.000000e+00> : vector<10x16xf32>
    %126 = tpu.matmul %122#0, %35, %cst_144 {dimension_numbers = #tpu.dot_dimension_numbers<[1], [0], [0], [1], [0, 0, 1, 1], [], []>} : vector<10x16xf32>, vector<16x16xf32>, vector<10x16xf32> -> vector<10x16xf32>
    %127 = vector.broadcast %36 : vector<1x16xf32> to vector<10x16xf32>
    %128 = arith.addf %126, %127 : vector<10x16xf32>
    %cst_145 = arith.constant dense<0.000000e+00> : vector<10x16xf32>
    %129 = tpu.matmul %122#0, %37, %cst_145 {dimension_numbers = #tpu.dot_dimension_numbers<[1], [0], [0], [1], [0, 0, 1, 1], [], []>} : vector<10x16xf32>, vector<16x16xf32>, vector<10x16xf32> -> vector<10x16xf32>
    %130 = vector.broadcast %38 : vector<1x16xf32> to vector<10x16xf32>
    %131 = arith.addf %129, %130 : vector<10x16xf32>
    %132 = arith.mulf %125, %128 : vector<10x16xf32>
    %cst_146 = arith.constant dense<0.000000e+00> : vector<10xf32>
    %133 = vector.multi_reduction <add>, %132, %cst_146 [1] : vector<10x16xf32> to vector<10xf32>
    %134 = vector.shape_cast %133 : vector<10xf32> to vector<10x1xf32>
    %cst_147 = arith.constant dense<0xFF800000> : vector<1xf32>
    %135 = vector.multi_reduction <maximumf>, %134, %cst_147 [0] : vector<10x1xf32> to vector<1xf32>
    %136 = vector.shape_cast %135 : vector<1xf32> to vector<1x1xf32>
    %137 = vector.broadcast %136 : vector<1x1xf32> to vector<10x1xf32>
    %138 = arith.subf %134, %137 : vector<10x1xf32>
    %139 = math.exp %138 : vector<10x1xf32>
    %cst_148 = arith.constant dense<0.000000e+00> : vector<1xf32>
    %140 = vector.multi_reduction <add>, %139, %cst_148 [0] : vector<10x1xf32> to vector<1xf32>
    %141 = vector.shape_cast %140 : vector<1xf32> to vector<1x1xf32>
    %142 = vector.broadcast %141 : vector<1x1xf32> to vector<10x1xf32>
    %143 = arith.divf %139, %142 : vector<10x1xf32>
    %144 = vector.broadcast %143 : vector<10x1xf32> to vector<10x16xf32>
    %145 = arith.mulf %144, %131 : vector<10x16xf32>
    %cst_149 = arith.constant dense<0.000000e+00> : vector<16xf32>
    %146 = vector.multi_reduction <add>, %145, %cst_149 [0] : vector<10x16xf32> to vector<16xf32>
    %147 = vector.shape_cast %146 : vector<16xf32> to vector<1x16xf32>
    %cst_150 = arith.constant dense<0.000000e+00> : vector<1x30xf32>
    %148 = tpu.matmul %147, %39, %cst_150 {dimension_numbers = #tpu.dot_dimension_numbers<[1], [0], [0], [1], [0, 0, 1, 1], [], []>} : vector<1x16xf32>, vector<16x30xf32>, vector<1x30xf32> -> vector<1x30xf32>
    %c0_151 = arith.constant 0 : index
    %c0_152 = arith.constant 0 : index
    %c0_153 = arith.constant 0 : index
    %149 = vector.load %arg4[%c0_151, %c0_152, %c0_153] : memref<1x1x4xf32, #tpu.memory_space<vmem>>, vector<1x1x4xf32>
    %150 = vector.shape_cast %149 : vector<1x1x4xf32> to vector<1x4xf32>
    %cst_154 = arith.constant dense<0.000000e+00> : vector<1x30xf32>
    %151 = tpu.matmul %150, %40, %cst_154 {dimension_numbers = #tpu.dot_dimension_numbers<[1], [0], [0], [1], [0, 0, 1, 1], [], []>} : vector<1x4xf32>, vector<4x30xf32>, vector<1x30xf32> -> vector<1x30xf32>
    %152 = arith.addf %148, %151 : vector<1x30xf32>
    %153 = arith.addf %152, %41 : vector<1x30xf32>
    %cst_155 = arith.constant 0.000000e+00 : f32
    %154 = vector.broadcast %cst_155 : f32 to vector<1x30xf32>
    %155 = arith.cmpf oge, %153, %154 : vector<1x30xf32>
    %cst_156 = arith.constant 0.00999999977 : f32
    %156 = vector.broadcast %cst_156 : f32 to vector<1x30xf32>
    %157 = arith.mulf %156, %153 : vector<1x30xf32>
    %158 = arith.select %155, %153, %157 : vector<1x30xi1>, vector<1x30xf32>
    %cst_157 = arith.constant dense<0.000000e+00> : vector<1x3xf32>
    %159 = tpu.matmul %158, %42, %cst_157 {dimension_numbers = #tpu.dot_dimension_numbers<[1], [0], [0], [1], [0, 0, 1, 1], [], []>} : vector<1x30xf32>, vector<30x3xf32>, vector<1x3xf32> -> vector<1x3xf32>
    %160 = arith.addf %159, %43 : vector<1x3xf32>
    %c0_158 = arith.constant 0 : index
    %c0_159 = arith.constant 0 : index
    %c0_160 = arith.constant 0 : index
    %161 = vector.load %arg59[%c0_158, %c0_159, %c0_160] : memref<1x1x3xf32, #tpu.memory_space<vmem>>, vector<1x1x3xf32>
    %162 = vector.shape_cast %161 : vector<1x1x3xf32> to vector<1x3xf32>
    %163 = vector.shape_cast %160 : vector<1x3xf32> to vector<1x1x3xf32>
    tpu.vector_store %arg59[%c0_158, %c0_159, %c0_160], %163 {strides = array<i32>} : memref<1x1x3xf32, #tpu.memory_space<vmem>>, vector<1x1x3xf32>,
    return
  }
  func.func @transform_0(%arg0: i32) -> (i32, i32, i32) {
    %c0_i32 = arith.constant 0 : i32
    %c0_i32_0 = arith.constant 0 : i32
    %c0_i32_1 = arith.constant 0 : i32
    return %arg0, %c0_i32, %c0_i32_0 : i32, i32, i32
  }
  func.func @transform_1(%arg0: i32) -> (i32, i32, i32) {
    %c0_i32 = arith.constant 0 : i32
    %c0_i32_0 = arith.constant 0 : i32
    %c0_i32_1 = arith.constant 0 : i32
    return %arg0, %c0_i32, %c0_i32_0 : i32, i32, i32
  }
  func.func @transform_2(%arg0: i32) -> (i32, i32, i32) {
    %c0_i32 = arith.constant 0 : i32
    %c0_i32_0 = arith.constant 0 : i32
    %c0_i32_1 = arith.constant 0 : i32
    return %arg0, %c0_i32, %c0_i32_0 : i32, i32, i32
  }
  func.func @transform_3(%arg0: i32) -> (i32, i32, i32) {
    %c0_i32 = arith.constant 0 : i32
    %c0_i32_0 = arith.constant 0 : i32
    %c0_i32_1 = arith.constant 0 : i32
    return %arg0, %c0_i32, %c0_i32_0 : i32, i32, i32
  }
  func.func @transform_4(%arg0: i32) -> (i32, i32, i32) {
    %c0_i32 = arith.constant 0 : i32
    %c0_i32_0 = arith.constant 0 : i32
    %c0_i32_1 = arith.constant 0 : i32
    return %arg0, %c0_i32, %c0_i32_0 : i32, i32, i32
  }
  func.func @transform_5(%arg0: i32) -> (i32, i32, i32) {
    %c0_i32 = arith.constant 0 : i32
    %c0_i32_0 = arith.constant 0 : i32
    %c0_i32_1 = arith.constant 0 : i32
    return %arg0, %c0_i32, %c0_i32_0 : i32, i32, i32
  }
  func.func @transform_6(%arg0: i32) -> (i32, i32, i32) {
    %c0_i32 = arith.constant 0 : i32
    %c0_i32_0 = arith.constant 0 : i32
    %c0_i32_1 = arith.constant 0 : i32
    return %arg0, %c0_i32, %c0_i32_0 : i32, i32, i32
  }
  func.func @transform_7(%arg0: i32) -> (i32, i32, i32) {
    %c0_i32 = arith.constant 0 : i32
    %c0_i32_0 = arith.constant 0 : i32
    %c0_i32_1 = arith.constant 0 : i32
    return %arg0, %c0_i32, %c0_i32_0 : i32, i32, i32
  }
  func.func @transform_8(%arg0: i32) -> (i32, i32, i32) {
    %c0_i32 = arith.constant 0 : i32
    %c0_i32_0 = arith.constant 0 : i32
    %c0_i32_1 = arith.constant 0 : i32
    return %arg0, %c0_i32, %c0_i32_0 : i32, i32, i32
  }
  func.func @transform_9(%arg0: i32) -> (i32, i32, i32) {
    %c0_i32 = arith.constant 0 : i32
    %c0_i32_0 = arith.constant 0 : i32
    %c0_i32_1 = arith.constant 0 : i32
    return %arg0, %c0_i32, %c0_i32_0 : i32, i32, i32
  }
  func.func @transform_10(%arg0: i32) -> (i32, i32, i32) {
    %c0_i32 = arith.constant 0 : i32
    %c0_i32_0 = arith.constant 0 : i32
    %c0_i32_1 = arith.constant 0 : i32
    return %arg0, %c0_i32, %c0_i32_0 : i32, i32, i32
  }
  func.func @transform_11(%arg0: i32) -> (i32, i32, i32) {
    %c0_i32 = arith.constant 0 : i32
    %c0_i32_0 = arith.constant 0 : i32
    %c0_i32_1 = arith.constant 0 : i32
    return %arg0, %c0_i32, %c0_i32_0 : i32, i32, i32
  }
  func.func @transform_12(%arg0: i32) -> (i32, i32, i32) {
    %c0_i32 = arith.constant 0 : i32
    %c0_i32_0 = arith.constant 0 : i32
    %c0_i32_1 = arith.constant 0 : i32
    return %arg0, %c0_i32, %c0_i32_0 : i32, i32, i32
  }
  func.func @transform_13(%arg0: i32) -> (i32, i32, i32) {
    %c0_i32 = arith.constant 0 : i32
    %c0_i32_0 = arith.constant 0 : i32
    %c0_i32_1 = arith.constant 0 : i32
    return %arg0, %c0_i32, %c0_i32_0 : i32, i32, i32
  }
  func.func @transform_14(%arg0: i32) -> (i32, i32) {
    %c0_i32 = arith.constant 0 : i32
    %c0_i32_0 = arith.constant 0 : i32
    %c0_i32_1 = arith.constant 0 : i32
    return %c0_i32, %c0_i32_0 : i32, i32
  }
  func.func @transform_15(%arg0: i32) -> (i32, i32) {
    %c0_i32 = arith.constant 0 : i32
    %c0_i32_0 = arith.constant 0 : i32
    %c0_i32_1 = arith.constant 0 : i32
    return %c0_i32, %c0_i32_0 : i32, i32
  }
  func.func @transform_16(%arg0: i32) -> (i32, i32) {
    %c0_i32 = arith.constant 0 : i32
    %c0_i32_0 = arith.constant 0 : i32
    %c0_i32_1 = arith.constant 0 : i32
    return %c0_i32, %c0_i32_0 : i32, i32
  }
  func.func @transform_17(%arg0: i32) -> (i32, i32) {
    %c0_i32 = arith.constant 0 : i32
    %c0_i32_0 = arith.constant 0 : i32
    %c0_i32_1 = arith.constant 0 : i32
    return %c0_i32, %c0_i32_0 : i32, i32
  }
  func.func @transform_18(%arg0: i32) -> (i32, i32) {
    %c0_i32 = arith.constant 0 : i32
    %c0_i32_0 = arith.constant 0 : i32
    %c0_i32_1 = arith.constant 0 : i32
    return %c0_i32, %c0_i32_0 : i32, i32
  }
  func.func @transform_19(%arg0: i32) -> (i32, i32) {
    %c0_i32 = arith.constant 0 : i32
    %c0_i32_0 = arith.constant 0 : i32
    %c0_i32_1 = arith.constant 0 : i32
    return %c0_i32, %c0_i32_0 : i32, i32
  }
  func.func @transform_20(%arg0: i32) -> (i32, i32) {
    %c0_i32 = arith.constant 0 : i32
    %c0_i32_0 = arith.constant 0 : i32
    %c0_i32_1 = arith.constant 0 : i32
    return %c0_i32, %c0_i32_0 : i32, i32
  }
  func.func @transform_21(%arg0: i32) -> (i32, i32) {
    %c0_i32 = arith.constant 0 : i32
    %c0_i32_0 = arith.constant 0 : i32
    %c0_i32_1 = arith.constant 0 : i32
    return %c0_i32, %c0_i32_0 : i32, i32
  }
  func.func @transform_22(%arg0: i32) -> (i32, i32) {
    %c0_i32 = arith.constant 0 : i32
    %c0_i32_0 = arith.constant 0 : i32
    %c0_i32_1 = arith.constant 0 : i32
    return %c0_i32, %c0_i32_0 : i32, i32
  }
  func.func @transform_23(%arg0: i32) -> (i32, i32) {
    %c0_i32 = arith.constant 0 : i32
    %c0_i32_0 = arith.constant 0 : i32
    %c0_i32_1 = arith.constant 0 : i32
    return %c0_i32, %c0_i32_0 : i32, i32
  }
  func.func @transform_24(%arg0: i32) -> (i32, i32) {
    %c0_i32 = arith.constant 0 : i32
    %c0_i32_0 = arith.constant 0 : i32
    %c0_i32_1 = arith.constant 0 : i32
    return %c0_i32, %c0_i32_0 : i32, i32
  }
  func.func @transform_25(%arg0: i32) -> (i32, i32) {
    %c0_i32 = arith.constant 0 : i32
    %c0_i32_0 = arith.constant 0 : i32
    %c0_i32_1 = arith.constant 0 : i32
    return %c0_i32, %c0_i32_0 : i32, i32
  }
  func.func @transform_26(%arg0: i32) -> (i32, i32) {
    %c0_i32 = arith.constant 0 : i32
    %c0_i32_0 = arith.constant 0 : i32
    %c0_i32_1 = arith.constant 0 : i32
    return %c0_i32, %c0_i32_0 : i32, i32
  }
  func.func @transform_27(%arg0: i32) -> (i32, i32) {
    %c0_i32 = arith.constant 0 : i32
    %c0_i32_0 = arith.constant 0 : i32
    %c0_i32_1 = arith.constant 0 : i32
    return %c0_i32, %c0_i32_0 : i32, i32
  }
  func.func @transform_28(%arg0: i32) -> (i32, i32) {
    %c0_i32 = arith.constant 0 : i32
    %c0_i32_0 = arith.constant 0 : i32
    %c0_i32_1 = arith.constant 0 : i32
    return %c0_i32, %c0_i32_0 : i32, i32
  }
  func.func @transform_29(%arg0: i32) -> (i32, i32) {
    %c0_i32 = arith.constant 0 : i32
    %c0_i32_0 = arith.constant 0 : i32
    %c0_i32_1 = arith.constant 0 : i32
    return %c0_i32, %c0_i32_0 : i32, i32
  }
  func.func @transform_30(%arg0: i32) -> (i32, i32) {
    %c0_i32 = arith.constant 0 : i32
    %c0_i32_0 = arith.constant 0 : i32
    %c0_i32_1 = arith.constant 0 : i32
    return %c0_i32, %c0_i32_0 : i32, i32
  }
  func.func @transform_31(%arg0: i32) -> (i32, i32) {
    %c0_i32 = arith.constant 0 : i32
    %c0_i32_0 = arith.constant 0 : i32
    %c0_i32_1 = arith.constant 0 : i32
    return %c0_i32, %c0_i32_0 : i32, i32
  }
  func.func @transform_32(%arg0: i32) -> (i32, i32) {
    %c0_i32 = arith.constant 0 : i32
    %c0_i32_0 = arith.constant 0 : i32
    %c0_i32_1 = arith.constant 0 : i32
    return %c0_i32, %c0_i32_0 : i32, i32
  }
  func.func @transform_33(%arg0: i32) -> (i32, i32) {
    %c0_i32 = arith.constant 0 : i32
    %c0_i32_0 = arith.constant 0 : i32
    %c0_i32_1 = arith.constant 0 : i32
    return %c0_i32, %c0_i32_0 : i32, i32
  }
  func.func @transform_34(%arg0: i32) -> (i32, i32) {
    %c0_i32 = arith.constant 0 : i32
    %c0_i32_0 = arith.constant 0 : i32
    %c0_i32_1 = arith.constant 0 : i32
    return %c0_i32, %c0_i32_0 : i32, i32
  }
  func.func @transform_35(%arg0: i32) -> (i32, i32) {
    %c0_i32 = arith.constant 0 : i32
    %c0_i32_0 = arith.constant 0 : i32
    %c0_i32_1 = arith.constant 0 : i32
    return %c0_i32, %c0_i32_0 : i32, i32
  }
  func.func @transform_36(%arg0: i32) -> (i32, i32) {
    %c0_i32 = arith.constant 0 : i32
    %c0_i32_0 = arith.constant 0 : i32
    %c0_i32_1 = arith.constant 0 : i32
    return %c0_i32, %c0_i32_0 : i32, i32
  }
  func.func @transform_37(%arg0: i32) -> (i32, i32) {
    %c0_i32 = arith.constant 0 : i32
    %c0_i32_0 = arith.constant 0 : i32
    %c0_i32_1 = arith.constant 0 : i32
    return %c0_i32, %c0_i32_0 : i32, i32
  }
  func.func @transform_38(%arg0: i32) -> (i32, i32) {
    %c0_i32 = arith.constant 0 : i32
    %c0_i32_0 = arith.constant 0 : i32
    %c0_i32_1 = arith.constant 0 : i32
    return %c0_i32, %c0_i32_0 : i32, i32
  }
  func.func @transform_39(%arg0: i32) -> (i32, i32) {
    %c0_i32 = arith.constant 0 : i32
    %c0_i32_0 = arith.constant 0 : i32
    %c0_i32_1 = arith.constant 0 : i32
    return %c0_i32, %c0_i32_0 : i32, i32
  }
  func.func @transform_40(%arg0: i32) -> (i32, i32) {
    %c0_i32 = arith.constant 0 : i32
    %c0_i32_0 = arith.constant 0 : i32
    %c0_i32_1 = arith.constant 0 : i32
    return %c0_i32, %c0_i32_0 : i32, i32
  }
  func.func @transform_41(%arg0: i32) -> (i32, i32) {
    %c0_i32 = arith.constant 0 : i32
    %c0_i32_0 = arith.constant 0 : i32
    %c0_i32_1 = arith.constant 0 : i32
    return %c0_i32, %c0_i32_0 : i32, i32
  }
  func.func @transform_42(%arg0: i32) -> (i32, i32) {
    %c0_i32 = arith.constant 0 : i32
    %c0_i32_0 = arith.constant 0 : i32
    %c0_i32_1 = arith.constant 0 : i32
    return %c0_i32, %c0_i32_0 : i32, i32
  }
  func.func @transform_43(%arg0: i32) -> (i32, i32) {
    %c0_i32 = arith.constant 0 : i32
    %c0_i32_0 = arith.constant 0 : i32
    %c0_i32_1 = arith.constant 0 : i32
    return %c0_i32, %c0_i32_0 : i32, i32
  }
  func.func @transform_44(%arg0: i32) -> (i32, i32) {
    %c0_i32 = arith.constant 0 : i32
    %c0_i32_0 = arith.constant 0 : i32
    %c0_i32_1 = arith.constant 0 : i32
    return %c0_i32, %c0_i32_0 : i32, i32
  }
  func.func @transform_45(%arg0: i32) -> (i32, i32) {
    %c0_i32 = arith.constant 0 : i32
    %c0_i32_0 = arith.constant 0 : i32
    %c0_i32_1 = arith.constant 0 : i32
    return %c0_i32, %c0_i32_0 : i32, i32
  }
  func.func @transform_46(%arg0: i32) -> (i32, i32) {
    %c0_i32 = arith.constant 0 : i32
    %c0_i32_0 = arith.constant 0 : i32
    %c0_i32_1 = arith.constant 0 : i32
    return %c0_i32, %c0_i32_0 : i32, i32
  }
  func.func @transform_47(%arg0: i32) -> (i32, i32) {
    %c0_i32 = arith.constant 0 : i32
    %c0_i32_0 = arith.constant 0 : i32
    %c0_i32_1 = arith.constant 0 : i32
    return %c0_i32, %c0_i32_0 : i32, i32
  }
  func.func @transform_48(%arg0: i32) -> (i32, i32) {
    %c0_i32 = arith.constant 0 : i32
    %c0_i32_0 = arith.constant 0 : i32
    %c0_i32_1 = arith.constant 0 : i32
    return %c0_i32, %c0_i32_0 : i32, i32
  }
  func.func @transform_49(%arg0: i32) -> (i32, i32) {
    %c0_i32 = arith.constant 0 : i32
    %c0_i32_0 = arith.constant 0 : i32
    %c0_i32_1 = arith.constant 0 : i32
    return %c0_i32, %c0_i32_0 : i32, i32
  }
  func.func @transform_50(%arg0: i32) -> (i32, i32) {
    %c0_i32 = arith.constant 0 : i32
    %c0_i32_0 = arith.constant 0 : i32
    %c0_i32_1 = arith.constant 0 : i32
    return %c0_i32, %c0_i32_0 : i32, i32
  }
  func.func @transform_51(%arg0: i32) -> (i32, i32) {
    %c0_i32 = arith.constant 0 : i32
    %c0_i32_0 = arith.constant 0 : i32
    %c0_i32_1 = arith.constant 0 : i32
    return %c0_i32, %c0_i32_0 : i32, i32
  }
  func.func @transform_52(%arg0: i32) -> (i32, i32) {
    %c0_i32 = arith.constant 0 : i32
    %c0_i32_0 = arith.constant 0 : i32
    %c0_i32_1 = arith.constant 0 : i32
    return %c0_i32, %c0_i32_0 : i32, i32
  }
  func.func @transform_53(%arg0: i32) -> (i32, i32) {
    %c0_i32 = arith.constant 0 : i32
    %c0_i32_0 = arith.constant 0 : i32
    %c0_i32_1 = arith.constant 0 : i32
    return %c0_i32, %c0_i32_0 : i32, i32
  }
  func.func @transform_54(%arg0: i32) -> (i32, i32) {
    %c0_i32 = arith.constant 0 : i32
    %c0_i32_0 = arith.constant 0 : i32
    %c0_i32_1 = arith.constant 0 : i32
    return %c0_i32, %c0_i32_0 : i32, i32
  }
  func.func @transform_55(%arg0: i32) -> (i32, i32) {
    %c0_i32 = arith.constant 0 : i32
    %c0_i32_0 = arith.constant 0 : i32
    %c0_i32_1 = arith.constant 0 : i32
    return %c0_i32, %c0_i32_0 : i32, i32
  }
  func.func @transform_56(%arg0: i32) -> (i32, i32) {
    %c0_i32 = arith.constant 0 : i32
    %c0_i32_0 = arith.constant 0 : i32
    %c0_i32_1 = arith.constant 0 : i32
    return %c0_i32, %c0_i32_0 : i32, i32
  }
  func.func @transform_57(%arg0: i32) -> (i32, i32) {
    %c0_i32 = arith.constant 0 : i32
    %c0_i32_0 = arith.constant 0 : i32
    %c0_i32_1 = arith.constant 0 : i32
    return %c0_i32, %c0_i32_0 : i32, i32
  }
  func.func @transform_58(%arg0: i32) -> (i32, i32, i32) {
    %c0_i32 = arith.constant 0 : i32
    %c0_i32_0 = arith.constant 0 : i32
    %c0_i32_1 = arith.constant 0 : i32
    return %arg0, %c0_i32, %c0_i32_0 : i32, i32, i32
  }
}

</mosaic_0001>

<bundles_post_ra>
// kernel: tpu_custom_call.1
= control target key start
LH: loop header
LB: loop body
LE: loop exit
PB: predicated region body
PF: predicated region fallthrough
CT: control target
= control target key end

     0   :  { %s5959_s6 = smov 1   ;;  %s5960_s10 = smov 2   ;;  %s7011_s0 = inlined_call_operand.smem [shape: u32[59], index: -1, kind: input, shape index: {}] }
   0x1   :  { %s6036_s5 = sld [smem:[%s7011_s0]]   ;;  %s5961_s14 = smov 3  }
   0x2   :  { %s6041_s9 = sld [smem:[%s7011_s0 + %s5959_s6]]   ;;  %s5962_s18 = smov 4  }
   0x3   :  { %s6046_s13 = sld [smem:[%s7011_s0 + %s5960_s10]]   ;;  %s5963_s22 = smov 5  }
   0x4   :  { %s6051_s17 = sld [smem:[%s7011_s0 + %s5961_s14]]   ;;  %s5964_s26 = smov 6  }
   0x5   :  { %s6056_s21 = sld [smem:[%s7011_s0 + %s5962_s18]]   ;;  %s5965_s30 = smov 7  }
   0x6   :  { %s6061_s25 = sld [smem:[%s7011_s0 + %s5963_s22]]   ;;  %s5966_s4 = smov 8  }
   0x7   :  { %7047 = sst [smem:[#allocation19_spill]] %s6036_s5  ;;  %s5967_s10 = smov 9  }
   0x8   :  { %7048 = sst [smem:[#allocation20_spill]] %s6041_s9  ;;  %s5968_s15 = smov 10  }
   0x9   :  { %7049 = sst [smem:[#allocation21_spill]] %s6046_s13  ;;  %s5969_s20 = smov 11  }
   0xa   :  { %s6066_s29 = sld [smem:[%s7011_s0 + %s5964_s26]]   ;;  %s5970_s26 = smov 12  }
   0xb   :  { %7050 = sst [smem:[#allocation22_spill]] %s6056_s21  ;;  %s5971_s1 = smov 13  }
   0xc   :  { %7051 = sst [smem:[#allocation23_spill]] %s6061_s25  ;;  %s5972_s7 = smov 14  }
   0xd   :  { %s6071_s3 = sld [smem:[%s7011_s0 + %s5965_s30]]   ;;  %s5974_s22 = smov 16  }
   0xe   :  { %s6076_s8 = sld [smem:[%s7011_s0 + %s5966_s4]]   ;;  %s5975_s28 = smov 17  }
   0xf   :  { %s6081_s14 = sld [smem:[%s7011_s0 + %s5967_s10]]   ;;  %s5996_s10 = smov 48  }
  0x10   :  { %7052 = sst [smem:[#allocation24_spill]] %s6066_s29  ;;  %s5997_s16 = smov 49  }
  0x11   :  { %s6086_s19 = sld [smem:[%s7011_s0 + %s5968_s15]]   ;;  %s5973_s15 = smov 15  }
  0x12   :  { %s6091_s24 = sld [smem:[%s7011_s0 + %s5969_s20]]   ;;  %s5998_s23 = smov 50  }
  0x13   :  { %7053 = sst [smem:[#allocation25_spill]] %s6071_s3 }
  0x14   :  { %7054 = sst [smem:[#allocation26_spill]] %s6076_s8 }
  0x15   :  { %7055 = sst [smem:[#allocation27_spill]] %s6081_s14 }
  0x16   :  { %s6096_s30 = sld [smem:[%s7011_s0 + %s5970_s26]]   ;;  %s6011_s26 = smov 41  }
  0x17   :  { %7056 = sst [smem:[#allocation28_spill]] %s6086_s19 }
  0x18   :  { %7057 = sst [smem:[#allocation29_spill]] %s6091_s24 }
  0x19   :  { %s6101_s6 = sld [smem:[%s7011_s0 + %s5971_s1]]   ;;  %s5995_s1 = smov 47  }
  0x1a   :  { %s6106_s12 = sld [smem:[%s7011_s0 + %s5972_s7]]   ;;  %s5976_s7 = smov 18  }
  0x1b   :  { %s6111_s20 = sld [smem:[%s7011_s0 + %s5973_s15]]   ;;  %s5977_s15 = smov 19  }
  0x1c   :  { %7058 = sst [smem:[#allocation30_spill]] %s6096_s30 }
  0x1d   :  { %s6116_s27 = sld [smem:[%s7011_s0 + %s5974_s22]]   ;;  %s5978_s22 = smov 20  }
  0x1e   :  { %s6121_s4 = sld [smem:[%s7011_s0 + %s5975_s28]]   ;;  %s5979_s28 = smov 21  }
  0x1f   :  { %7059 = sst [smem:[#allocation31_spill]] %s6101_s6 }
  0x20   :  { %7060 = sst [smem:[#allocation32_spill]] %s6106_s12 }
  0x21   :  { %7061 = sst [smem:[#allocation33_spill]] %s6111_s20 }
  0x22   :  { %s6126_s24 = sld [smem:[%s7011_s0 + %s5976_s7]]   ;;  %s5980_s7 = smov 22  }
  0x23   :  { %s6131_s30 = sld [smem:[%s7011_s0 + %s5977_s15]]   ;;  %s5981_s15 = smov 23  }
  0x24   :  { %7062 = sst [smem:[#allocation34_spill]] %s6121_s4 }
  0x25   :  { %s6136_s14 = sld [smem:[%s7011_s0 + %s5978_s22]]   ;;  %s5982_s22 = smov 24  }
  0x26   :  { %s6141_s21 = sld [smem:[%s7011_s0 + %s5979_s28]]   ;;  %s5983_s28 = smov 25  }
  0x27   :  { %s6146_s8 = sld [smem:[%s7011_s0 + %s5980_s7]]   ;;  %s5984_s7 = smov 26  }
  0x28   :  { %7063 = sst [smem:[#allocation35_spill]] %s6126_s24 }
  0x29   :  { %s6151_s25 = sld [smem:[%s7011_s0 + %s5981_s15]]   ;;  %s5985_s15 = smov 27  }
  0x2a   :  { %s6156_s13 = sld [smem:[%s7011_s0 + %s5982_s22]]   ;;  %s5986_s22 = smov 28  }
  0x2b   :  { %7064 = sst [smem:[#allocation36_spill]] %s6136_s14 }
  0x2c   :  { %7065 = sst [smem:[#allocation37_spill]] %s6141_s21 }
  0x2d   :  { %7066 = sst [smem:[#allocation38_spill]] %s6146_s8 }
  0x2e   :  { %s6161_s9 = sld [smem:[%s7011_s0 + %s5983_s28]]   ;;  %s5987_s28 = smov 29  }
  0x2f   :  { %7067 = sst [smem:[#allocation39_spill]] %s6151_s25  ;;  %s6015_s25 = smov 45  }
  0x30   :  { %7068 = sst [smem:[#allocation40_spill]] %s6156_s13  ;;  %s6014_s13 = smov 44  }
  0x31   :  { %s6166_s6 = sld [smem:[%s7011_s0 + %s5984_s7]]   ;;  %s5988_s7 = smov 30  }
  0x32   :  { %s6171_s5 = sld [smem:[%s7011_s0 + %s5985_s15]]   ;;  %s5989_s15 = smov 31  }
  0x33   :  { %s6176_s19 = sld [smem:[%s7011_s0 + %s5986_s22]]   ;;  %s5990_s22 = smov 32  }
  0x34   :  { %7069 = sst [smem:[#allocation41_spill]] %s6161_s9  ;;  %s6010_s9 = smov 40  }
  0x35   :  { %s6181_s3 = sld [smem:[%s7011_s0 + %s5987_s28]]   ;;  %s5991_s28 = smov 33  }
  0x36   :  { %s6186_s29 = sld [smem:[%s7011_s0 + %s5988_s7]]   ;;  %s5992_s7 = smov 34  }
  0x37   :  { %7070 = sst [smem:[#allocation42_spill]] %s6166_s6 }
  0x38   :  { %7071 = sst [smem:[#allocation43_spill]] %s6171_s5 }
  0x39   :  { %7072 = sst [smem:[#allocation44_spill]] %s6176_s19 }
  0x3a   :  { %s6191_s5 = sld [smem:[%s7011_s0 + %s5989_s15]]   ;;  %s5993_s15 = smov 35  }
  0x3b   :  { %7073 = sst [smem:[#allocation45_spill]] %s6181_s3 }
  0x3c   :  { %7074 = sst [smem:[#allocation46_spill]] %s6186_s29 }
  0x3d   :  { %s6196_s19 = sld [smem:[%s7011_s0 + %s5990_s22]]   ;;  %s5994_s22 = smov 36  }
  0x3e   :  { %s6201_s3 = sld [smem:[%s7011_s0 + %s5991_s28]]   ;;  %s6003_s28 = smov 55  }
  0x3f   :  { %s6206_s29 = sld [smem:[%s7011_s0 + %s5992_s7]]   ;;  %s6008_s7 = smov 38  }
  0x40   :  { %7075 = sst [smem:[#allocation47_spill]] %s6191_s5 }
  0x41   :  { %s6211_s5 = sld [smem:[%s7011_s0 + %s5993_s15]]  }
  0x42   :  { %s6234_s6 = sld [smem:[%s7011_s0 + %s5998_s23]]   ;;  %s6002_s23 = smov 54  }
  0x43   :  { %7076 = sst [smem:[#allocation48_spill]] %s6196_s19 }
  0x44   :  { %7077 = sst [smem:[#allocation49_spill]] %s6201_s3 }
  0x45   :  { %7078 = sst [smem:[#allocation50_spill]] %s6206_s29 }
  0x46   :  { %s5037_s19 = sld [smem:[%s7011_s0 + %s5994_s22]]  }
  0x47   :  { %7079 = sst [smem:[#allocation51_spill]] %s6211_s5 }
  0x48   :  { %s6219_s3 = sld [smem:[%s7011_s0 + %s5995_s1]]   ;;  %s5999_s1 = smov 51  }
  0x49   :  { %s6224_s29 = sld [smem:[%s7011_s0 + %s5996_s10]]   ;;  %s6000_s10 = smov 52  }
  0x4a   :  { %s6229_s5 = sld [smem:[%s7011_s0 + %s5997_s16]]   ;;  %s6001_s16 = smov 53  }
  0x4b   :  { %7083 = sst [smem:[#allocation55_spill]] %s6234_s6  ;;  %s6006_s6 = smov 58  }
  0x4c   :  { %v122_v0 = vstv %s5037_s19  ;;  %s6249_s22 = sld [smem:[%s7011_s0 + %s6001_s16]]   ;;  %s6004_s19 = smov 56  }
  0x4d   :  { %123 = vst [vmem:[#allocation2] sm:$0x1] %v122_v0  ;;  %s6264_s15 = sld [smem:[%s7011_s0 + %s6004_s19]]   ;;  %s6005_s16 = smov 57  }
  0x4e   :  { %7080 = sst [smem:[#allocation52_spill]] %s6219_s3  ;;  %s6013_s19 = smov 43  }
  0x4f   :  { %7081 = sst [smem:[#allocation53_spill]] %s6224_s29 }
  0x50   :  { %7082 = sst [smem:[#allocation54_spill]] %s6229_s5  ;;  %s6009_s5 = smov 39  }
  0x51   :  { %s6239_s3 = sld [smem:[%s7011_s0 + %s5999_s1]]  }
  0x52   :  { %s6244_s29 = sld [smem:[%s7011_s0 + %s6000_s10]]  }
  0x53   :  { %7086 = sst [smem:[#allocation58_spill]] %s6249_s22 }
  0x54   :  { %s6254_s1 = sld [smem:[%s7011_s0 + %s6002_s23]]  }
  0x55   :  { %s6259_s10 = sld [smem:[%s7011_s0 + %s6003_s28]]   ;;  %s6012_s28 = smov 42  }
  0x56   :  { %7089 = sst [smem:[#allocation61_spill]] %s6264_s15 }
  0x57   :  { %7084 = sst [smem:[#allocation56_spill]] %s6239_s3  ;;  %s6007_s3 = smov 37  }
  0x58   :  { %7085 = sst [smem:[#allocation57_spill]] %s6244_s29 }
  0x59   :  { %s6269_s29 = sld [smem:[%s7011_s0 + %s6005_s16]]  }
  0x5a   :  { %7087 = sst [smem:[#allocation59_spill]] %s6254_s1 }
  0x5b   :  { %7088 = sst [smem:[#allocation60_spill]] %s6259_s10 }
  0x5c   :  { %s6274_s1 = sld [smem:[%s7011_s0 + %s6006_s6]]  }
  0x5d   :  { %s5038_s10 = sld [smem:[%s7011_s0 + %s6007_s3]]  }
  0x5e   :  { %s5039_s15 = sld [smem:[%s7011_s0 + %s6008_s7]]  }
  0x5f   :  { %s5040_s18 = sld [smem:[%s7011_s0 + %s6009_s5]]  }
  0x60   :  { %s5041_s6 = sld [smem:[%s7011_s0 + %s6010_s9]]  }
  0x61   :  { %s5042_s3 = sld [smem:[%s7011_s0 + %s6011_s26]]  }
  0x62   :  { %7090 = sst [smem:[#allocation62_spill]] %s6274_s1 }
  0x63   :  { %s5043_s7 = sld [smem:[%s7011_s0 + %s6012_s28]]   ;;  %v124_v1 = vstv %s5038_s10  ;;  %s6016_s10 = smov 46  }
  0x64   :  { %s5044_s5 = sld [smem:[%s7011_s0 + %s6013_s19]]   ;;  %125 = vst [vmem:[#allocation3] sm:$0x1] %v124_v1  ;;  %v126_v2 = vstv %s5039_s15 }
  0x65   :  { %s5045_s23 = sld [smem:[%s7011_s0 + %s6014_s13]]   ;;  %127 = vst [vmem:[#allocation4] sm:$0x1] %v126_v2  ;;  %v128_v3 = vstv %s5040_s18 }
  0x66   :  { %s5046_s8 = sld [smem:[%s7011_s0 + %s6015_s25]]   ;;  %129 = vst [vmem:[#allocation5] sm:$0x1] %v128_v3  ;;  %v130_v4 = vstv %s5041_s6 }
  0x67   :  { %s5047_s19 = sld [smem:[%s7011_s0 + %s6016_s10]]   ;;  %131 = vst [vmem:[#allocation6] sm:$0x1] %v130_v4  ;;  %v132_v5 = vstv %s5042_s3 }
  0x68   :  { %133 = vst [vmem:[#allocation7] sm:$0x1] %v132_v5 }
  0x69   :  { %v134_v6 = vstv %s5043_s7 }
  0x6a   :  { %135 = vst [vmem:[#allocation8] sm:$0x1] %v134_v6  ;;  %v136_v7 = vstv %s5044_s5 }
  0x6b   :  { %137 = vst [vmem:[#allocation9] sm:$0x1] %v136_v7  ;;  %v138_v8 = vstv %s5045_s23 }
  0x6c   :  { %139 = vst [vmem:[#allocation10] sm:$0x1] %v138_v8  ;;  %v140_v9 = vstv %s5046_s8 }
  0x6d   :  { %141 = vst [vmem:[#allocation11] sm:$0x1] %v140_v9  ;;  %v142_v10 = vstv %s5047_s19 }
  0x6e   :  { %143 = vst [vmem:[#allocation12] sm:$0x1] %v142_v10 }
  0x6f   :  { %144 = vsyncpa [#allocation14], 0 }
  0x70   :  { %145 = vsyncpa [#allocation15], 0 }
  0x71   :  { %147 = vsyncpa [#allocation15 + $0x1], 0  ;;  %s6306_s15 = smov 0   ;;  %s6308_s18 = smov 0  }
  0x72   :  { %s6310_s0 = smov 0   ;;  %s6312_s6 = smov 0  }
  0x73 LB: > { %s7091_s24 = sld [smem:[#allocation35_spill]]  ;;  %s7092_s21 = sld [smem:[#allocation37_spill]]  ;;  %s5917_s15 = sphi %s6306_s15, %s7244_s15   ;;  %s5929_s6 = sphi %s6312_s6, %s7247_s6   ;;  %s5925_s0 = sphi %s6310_s0, %s7246_s0   ;;  %s5921_s18 = sphi %s6308_s18, %s7245_s18  }
  0x74   : > { %s7093_s14 = sld [smem:[#allocation36_spill]]  ;;  %s7094_s20 = sld [smem:[#allocation33_spill]] }
  0x75   : > { %s7095_s12 = sld [smem:[#allocation32_spill]]  ;;  %s6327_s3 = sadd.s32 4294967295, %s5929_s6  }
  0x76   : > { %s5061_s7 = sadd.s32 4294967294, %s5929_s6   ;;  %s6331_s11 = sadd.s32 1, %s5929_s6  }
  0x77   : > { %s1448_s22 = sadd.s32 1, %s5925_s0  ;;  %s1445_s5 = ssub.s32 %s5929_s6, %s6331_s11 }
  0x78   : > { %p1458_p0 = scmp.ne.s32.totalorder %s5925_s0, %s5921_s18  ;;  %p1446_p1 = scmp.eq.s32.totalorder %s1445_s5, 0 }
  0x79   : > { %p1459_p2 = scmp.eq.s32.totalorder %s6327_s3, 1  ;;  %p1464_p3 = scmp.ne.s32.totalorder %s5921_s18, %s5917_s15 }
  0x7a   : > { %p1465_p4 = scmp.eq.s32.totalorder %s5061_s7, 1  ;;  %p5062_p7 = scmp.ge.s32.totalorder %s5929_s6, 1 }
  0x7b   : > { %s6342_s13 = scalar_select %p1446_p1, %s5925_s0, %s1448_s22  }
  0x7c   : > { %p6344_p5 = por %p1459_p2, %p1458_p0  ;;  %p6348_p6 = por %p1465_p4, %p1464_p3 }
  0x7d   : > { %p1472_p8 = scmp.lt.s32.totalorder %s5929_s6, 3  ;;  %p7021_p9 = scmp.eq.s32.totalorder %s6327_s3, 0 }
  0x7e   : > { %s7096_s9 = scalar_select %p6344_p5, 1, 0 }
  0x7f   : > { %s7097_s16 = scalar_select %p6348_p6, 1, 0 }
  0x80   : > { %p6355_p10 = pnand %p5062_p7, %p1472_p8  ;;  %s6017_s25 = smov [#allocation13]  }
  0x81   : > { %s1614_s1 = sshll.u32 %s6017_s25, 4  ;;  %s5807_s8 = scalar_lea.hbm %s6269_s29, 16  ;;  %s1615_s1 = int_to_ptr.vmem [resolvable:$true] %s1614_s1 }
  0x82   : > { %s7098_s23 = scalar_select %p6355_p10, 1, 0 }
  0x83   : > { %p5587_p11 = pneg %p6355_p10  ;;  %p5808_p13 = scmp.ne.s32.totalorder %s6269_s29, %s5807_s8 }
  0x84   : > { %p5814_p3 = scmp.lt.u32.totalorder %s5807_s8, %s6269_s29 }
  0x85   : > { %p6363_p12 = pnand %p7021_p9, %p5587_p11 }
  0x87   : > { %p5809_p0 = pneg %p6363_p12 }
  0x89   : > { %p5810_p1 = pnand %p5809_p0, %p5808_p13 }
  0x8b   : > { %p5811_p2 = pneg %p5810_p1 }
  0x8d   : > { %p5816_p4 = pnand %p5814_p3, %p5811_p2 }
  0x8f   : > { %5819 = shalt.err (!%p5816_p4)
}
  0x90   : > { %s5820_s10 = scalar_lea.vmem %s1615_s1, 16  ;;  %s5827_s28 = scalar_lea.vmem %s1615_s1, 32 }
  0x91   : > { %p5821_p7 = scmp.ne.s32.totalorder %s1615_s1, %s5820_s10  ;;  %p5828_p5 = scmp.lt.s32.totalorder %s1615_s1, %s1615_s1 }
  0x92   : > { %p5829_p11 = scmp.lt.s32.totalorder %s5827_s28, %s5820_s10 }
  0x93   : > { %p5823_p8 = pnand %p5821_p7, %p5809_p0 }
  0x94   : > { %p5830_p9 = por %p5829_p11, %p5828_p5 }
  0x95   : > { %p5824_p6 = pneg %p5823_p8 }
  0x97   : > { %p5831_p10 = pnand %p5830_p9, %p5824_p6 }
  0x99   : > { %5834 = shalt.err (!%p5831_p10)
}
  0x9a   : > { %5590 = dma.hbm_to_vmem [thread:$0]  (!%p6363_p12), %s6269_s29, 16, %s1615_s1, [#allocation14]  }
  0x9b   : > { %p7100_p13 = scmp.ne.s32.totalorder %s7098_s23, 0 }
  0x9d   : > { %1728 = sbr.rel (%p7100_p13) target bundleno = 4063 (0xfdf), region = 252 }
  0xa4   : > { %p7101_p1 = scmp.eq.s32.totalorder %s6327_s3, 0 }
  0xa6   : > { %5908 = dma.done.wait (%p7101_p1), [#allocation14], 16   ;;  %p7102_p2 = pmov %p7101_p1 }
  0xa7   : > { %s7103_s4 = sld [smem:[#allocation34_spill]]  ;;  %p1915_p5 = scmp.lt.s32.totalorder %s6327_s3, 1  ;;  %v6018_v11 = vmov 0   ;;  %v6388_v12 = vld [vmem:[%s7095_s12] sm:$0xff]  ;;  %v6391_v13 = vld [vmem:[%s7095_s12 + $0x8] sm:$0xff]  ;;  %v7033_v33 = vlaneseq }
  0xa8   : > { %5910 = vsyncadd (%p7102_p2), [#allocation14], 4294967280  ;;  %5755 = vset.pattern.permute.xlu1 %v6018_v11  ;;  %5754 = vset.pattern.permute.xlu0 %v6018_v11  ;;  %s7104_s19 = sld [smem:[#allocation38_spill]]  ;;  %s7105_s22 = sld [smem:[#allocation39_spill]]  ;;  %7106 = vst [vmem:[#allocation63_spill] sm:$0xff] %v6388_v12  ;;  %v6394_v14 = vld [vmem:[%s7094_s20] sm:$0xff] }
  0xa9   : > { %s6383_s2 = scalar_select %p1915_p5, %s6327_s3, 1  ;;  %7107 = vst [vmem:[#allocation64_spill] sm:$0xff] %v6391_v13  ;;  %v6397_v15 = vld [vmem:[%s7094_s20 + $0x8] sm:$0xff]  ;;  %v6400_v16 = vld [vmem:[%s6116_s27] sm:$0xff]  ;;  %v6412_v20 = vld [vmem:[%s7091_s24 + $0x10] sm:$0xf] }
  0xaa   : > { %s7108_s5 = sld [smem:[#allocation40_spill]]  ;;  %s7109_s23 = sld [smem:[#allocation41_spill]]  ;;  %v6406_v18 = vld [vmem:[%s7091_s24] sm:$0xff]  ;;  %v6409_v19 = vld [vmem:[%s7091_s24 + $0x8] sm:$0xff]  ;;  %7114 = vst [vmem:[#allocation66_spill] sm:$0xff] %v6412_v20  ;;  %v6469_v40 = vshrl.u32 %v7033_v33, 7 }
  0xab   : > { %s7110_s25 = sld [smem:[#allocation42_spill]]  ;;  %s7112_s1 = sld [smem:[#allocation43_spill]]  ;;  %v6415_v21 = vld [vmem:[%s6131_s30] ss:$0 sm:$0xff]  ;;  %v6421_v23 = vld [vmem:[%s7093_s14 + $0x8] sm:$0xff] }
  0xac   : > { %s7113_s26 = sld [smem:[#allocation44_spill]]  ;;  %s7115_s8 = sld [smem:[#allocation45_spill]]  ;;  %7116 = vst [vmem:[#allocation67_spill] sm:$0xff] %v6415_v21  ;;  %v6418_v22 = vld [vmem:[%s7093_s14] sm:$0xff]  ;;  %7120 = vst [vmem:[#allocation69_spill] sm:$0xff] %v6421_v23  ;;  %v6427_v25 = vld [vmem:[%s7092_s21 + $0x8] sm:$0xff] }
  0xad   : > { %v6403_v17 = vld [vmem:[%s7103_s4] ss:$0 sm:$0xff]  ;;  %s7117_s10 = sld [smem:[#allocation46_spill]]  ;;  %7118 = vst [vmem:[#allocation68_spill] sm:$0xff] %v6418_v22  ;;  %s7119_s28 = sld [smem:[#allocation47_spill]]  ;;  %7123 = vst [vmem:[#allocation71_spill] sm:$0xff] %v6427_v25 }
  0xae   : > { %7111 = vst [vmem:[#allocation65_spill] sm:$0xff] %v6403_v17  ;;  %s7121_s7 = sld [smem:[#allocation48_spill]]  ;;  %v6424_v24 = vld [vmem:[%s7092_s21] sm:$0xff]  ;;  %s7124_s4 = sld [smem:[#allocation49_spill]]  ;;  %v6436_v28 = vld [vmem:[%s7105_s22 + $0x8] sm:$0xff]  ;;  %v6439_v29 = vld [vmem:[%s7105_s22 + $0x10] sm:$0xff] }
  0xaf   : > { %7122 = vst [vmem:[#allocation70_spill] sm:$0xff] %v6424_v24  ;;  %v6430_v26 = vld [vmem:[%s7104_s19] ss:$0 sm:$0xff]  ;;  %s7126_s12 = sld [smem:[#allocation50_spill]]  ;;  %7128 = vst [vmem:[#allocation74_spill] sm:$0xff] %v6436_v28  ;;  %s7130_s20 = sld [smem:[#allocation51_spill]] }
  0xb0   : > { %7125 = vst [vmem:[#allocation72_spill] sm:$0xff] %v6430_v26  ;;  %v6433_v27 = vld [vmem:[%s7105_s22] sm:$0xff]  ;;  %7129 = vst [vmem:[#allocation75_spill] sm:$0xff] %v6439_v29  ;;  %s7133_s19 = sld [smem:[#allocation52_spill]]  ;;  %v6502_v53 = vld [vmem:[#allocation10] ss:$0 sm:$0xff] }
  0xb1   : > { %7127 = vst [vmem:[#allocation73_spill] sm:$0xff] %v6433_v27  ;;  %v6442_v30 = vld [vmem:[%s7108_s5] ss:$0 sm:$0xff]  ;;  %s7134_s5 = sld [smem:[#allocation53_spill]]  ;;  %v6488_v46 = vld [vmem:[#allocation3] ss:$0 sm:$0xff] }
  0xb2   : > { %7131 = vst [vmem:[#allocation76_spill] sm:$0xff] %v6442_v30  ;;  %v6445_v31 = vld [vmem:[%s7109_s23] sm:$0xff]  ;;  %s6481_s23 = sshll.u32 %s6383_s2, 4  ;;  %v6504_v54 = vld [vmem:[#allocation11] ss:$0 sm:$0xff]  ;;  %s7148_s14 = sld [smem:[#allocation61_spill]] }
  0xb3   : > { %v6448_v32 = vld [vmem:[%s7110_s25] sm:$0xff]  ;;  %s7135_s25 = sld [smem:[#allocation54_spill]]  ;;  %v6506_v55 = vld [vmem:[#allocation12] ss:$0 sm:$0xff]  ;;  %s7151_s21 = sld [smem:[#allocation19_spill]]  ;;  %v2069_v4 = vadd.s32 8, %v6469_v40 }
  0xb4   : > { %7132 = vst [vmem:[#allocation77_spill] sm:$0xff] %v6448_v32  ;;  %v6451_v34 = vld [vmem:[%s7112_s1] ss:$0 sm:$0xff]  ;;  %v6490_v47 = vld [vmem:[#allocation4] ss:$0 sm:$0xff]  ;;  %s7139_s1 = sld [smem:[#allocation57_spill]] }
  0xb5   : > { %v6454_v35 = vld [vmem:[%s7113_s26] ss:$0 sm:$0xff]  ;;  %v6478_v43 = vld [vmem:[%s7126_s12 + $0x8] sm:$0xf]  ;;  %v6492_v48 = vld [vmem:[#allocation5] ss:$0 sm:$0xff] }
  0xb6   : > { %v6457_v36 = vld [vmem:[%s7115_s8] sm:$0xff]  ;;  %s7140_s26 = sld [smem:[#allocation24_spill]]  ;;  %s7142_s8 = sld [smem:[#allocation59_spill]]  ;;  %v6512_v57 = vld [vmem:[%s7133_s19 + $0x8] sm:$0xff]  ;;  %v7182_v26 = vmov 0.0  }
  0xb7   : > { %v6460_v37 = vld [vmem:[%s7117_s10] ss:$0 sm:$0xff]  ;;  %v6494_v49 = vld [vmem:[#allocation6] ss:$0 sm:$0xff]  ;;  %v6496_v50 = vld [vmem:[#allocation7] ss:$0 sm:$0xff] }
  0xb8   : > { %v6463_v38 = vld [vmem:[%s7119_s28] sm:$0xff]  ;;  %s7143_s10 = sld [smem:[#allocation25_spill]]  ;;  %s7144_s28 = sld [smem:[#allocation28_spill]]  ;;  %7147 = vst [vmem:[#allocation80_spill] sm:$0xff] %v6512_v57  ;;  %v6560_v7 = vld [vmem:[%s7148_s14 + $0x8] sm:$0xff]  ;;  %v6567_v8 = vld [vmem:[%s7148_s14 + $0x10] sm:$0xff] }
  0xb9   : > { %v6466_v39 = vld [vmem:[%s7121_s7] sm:$0xff]  ;;  %s7137_s7 = sld [smem:[#allocation55_spill]]  ;;  %v6521_v60 = vld [vmem:[%s7135_s25 + $0x8] sm:$0xff]  ;;  %s7159_s24 = sld [smem:[#allocation21_spill]]  ;;  %7166 = vst [vmem:[#allocation93_spill] sm:$0xff] %v6560_v7  ;;  %7167 = vst [vmem:[#allocation94_spill] sm:$0xff] %v6567_v8 }
  0xba   : > { %v6472_v41 = vld [vmem:[%s7124_s4] ss:$0 sm:$0xff]  ;;  %s7138_s4 = sld [smem:[#allocation56_spill]]  ;;  %v6498_v51 = vld [vmem:[#allocation8] ss:$0 sm:$0xff]  ;;  %7152 = vst [vmem:[#allocation83_spill] sm:$0xff] %v6521_v60 }
  0xbb   : > { %v6475_v42 = vld [vmem:[%s7126_s12] sm:$0xff]  ;;  %s7146_s12 = sld [smem:[#allocation60_spill]]  ;;  %s7153_s22 = sld [smem:[#allocation31_spill]]  ;;  %v6570_v9 = vld [vmem:[%s7148_s14 + $0x18] sm:$0x3f]  ;;  %v7037_v8 = vmov 0.0  }
  0xbc   : > { %v6484_v44 = vld [vmem:[%s7130_s20] ss:$0 sm:$0xff]  ;;  %s7141_s20 = sld [smem:[#allocation58_spill]]  ;;  %v6500_v52 = vld [vmem:[#allocation9] ss:$0 sm:$0xff]  ;;  %7168 = vst [vmem:[#allocation95_spill] sm:$0xff] %v6570_v9 }
  0xbd   : > { %v6486_v45 = vld [vmem:[#allocation2] ss:$0 sm:$0xff]  ;;  %v6572_v10 = vld [vmem:[#allocation13] sm:$0x1] }
  0xbe   : > { %7136 = vst [vmem:[#allocation78_spill] sm:$0xff] %v6486_v45  ;;  %v6509_v56 = vld [vmem:[%s7133_s19] sm:$0xff]  ;;  %s6537_s19 = scalar_lea.vmem %s7140_s26, %s6481_s23  ;;  %7169 = vst [vmem:[#allocation96_spill] sm:$0xff] %v6572_v10 }
  0xbf   : > { %7145 = vst [vmem:[#allocation79_spill] sm:$0xff] %v6509_v56  ;;  %v6515_v58 = vld [vmem:[%s7134_s5] ss:$0 sm:$0xff]  ;;  %s7158_s5 = sld [smem:[#allocation20_spill]] }
  0xc0   : > { %7149 = vst [vmem:[#allocation81_spill] sm:$0xff] %v6515_v58  ;;  %v6518_v59 = vld [vmem:[%s7135_s25] sm:$0xff]  ;;  %v6530_v63 = vld [vmem:[%s7138_s4 + $0x8] sm:$0xff]  ;;  %s7163_s25 = sld [smem:[#allocation23_spill]] }
  0xc1   : > { %7150 = vst [vmem:[#allocation82_spill] sm:$0xff] %v6518_v59  ;;  %v6524_v61 = vld [vmem:[%s7137_s7] ss:$0 sm:$0xff]  ;;  %7156 = vst [vmem:[#allocation86_spill] sm:$0xff] %v6530_v63  ;;  %s1949_s7 = scalar_lea.vmem %s7143_s10, %s6383_s2  ;;  %s1973_s26 = scalar_lea.vmem %s7153_s22, %s6383_s2 }
  0xc2   : > { %7154 = vst [vmem:[#allocation84_spill] sm:$0xff] %v6524_v61  ;;  %v6527_v62 = vld [vmem:[%s7138_s4] sm:$0xff]  ;;  %v6543_v2 = vld [vmem:[%s7141_s20 + $0x8] sm:$0xff]  ;;  %s1962_s4 = scalar_lea.vmem %s7144_s28, %s6383_s2  ;;  %s1929_s10 = scalar_lea.vmem %s7159_s24, %s6481_s23 }
  0xc3   : > { %7155 = vst [vmem:[#allocation85_spill] sm:$0xff] %v6527_v62  ;;  %v6533_v0 = vld [vmem:[%s7139_s1] ss:$0 sm:$0xff]  ;;  %7161 = vst [vmem:[#allocation89_spill] sm:$0xff] %v6543_v2  ;;  %s1919_s1 = scalar_lea.vmem %s7151_s21, %s6481_s23  ;;  %s7170_s21 = sld [smem:[#allocation26_spill]] }
  0xc4   : > { %7157 = vst [vmem:[#allocation87_spill] sm:$0xff] %v6533_v0  ;;  %v6540_v1 = vld [vmem:[%s7141_s20] sm:$0xff]  ;;  %s7171_s22 = sld [smem:[#allocation22_spill]]  ;;  %v6585_v10 = vld [vmem:[%s1919_s1 + $0x8] sm:$0x3]   ;;  %s6588_s24 = sshll.u32 %s6383_s2, 3 }
  0xc5   : > { %7160 = vst [vmem:[#allocation88_spill] sm:$0xff] %v6540_v1  ;;  %v6546_v3 = vld [vmem:[%s7142_s8] sm:$0xf]  ;;  %s1924_s8 = scalar_lea.vmem %s7158_s5, %s6481_s23  ;;  %v2039_v61 = vld [vmem:[%s1929_s10 + $0x8] sm:$0x3f]  }
  0xc6   : > { %7162 = vst [vmem:[#allocation90_spill] sm:$0xff] %v6546_v3  ;;  %v6554_v5 = vld [vmem:[%s7146_s12] sm:$0x1]  ;;  %s1941_s12 = scalar_lea.vmem %s7163_s25, %s6481_s23  ;;  %s7176_s25 = sld [smem:[#allocation27_spill]]  ;;  %v2037_v1 = vld [vmem:[%s1924_s8 + $0x8] sm:$0xf]  }
  0xc7   : > { %7164 = vst [vmem:[#allocation91_spill] sm:$0xff] %v6554_v5  ;;  %v6557_v6 = vld [vmem:[%s7148_s14] sm:$0xff]  ;;  %v2043_v62 = vld [vmem:[%s6537_s19 + $0x8] sm:$0xf] }
  0xc8   : > { %7165 = vst [vmem:[#allocation92_spill] sm:$0xff] %v6557_v6  ;;  %v2042_v11 = vld [vmem:[%s6537_s19] sm:$0xff]  ;;  %s1913_s19 = sand.u32 1, %s5921_s18  }
  0xc9   : > { %v5084_v33 = vld [vmem:[%s1949_s7] ss:$0 sm:$0xff]  ;;  %2058 = vperm.xlu1 %5755, %v2042_v11   ;;  %s1954_s28 = scalar_lea.vmem %s7170_s21, %s6481_s23  ;;  %s7179_s7 = sld [smem:[#allocation29_spill]] }
  0xca   : > { %v5085_v0 = vld [vmem:[%s1962_s4] ss:$0 sm:$0xff]  ;;  %vm2074_vm0 = vcmp.eq.s32.totalorder %v5084_v33, %v6469_v40  ;;  %vm2075_vm1 = vcmp.eq.s32.totalorder %v5084_v33, %v2069_v4  ;;  %s7177_s4 = sld [smem:[#allocation30_spill]]  ;;  %s1936_s5 = scalar_lea.vmem %s7171_s22, %s6588_s24 }
  0xcb   : > { %vm2107_vm2 = vcmp.eq.s32.totalorder %v5085_v0, %v6469_v40  ;;  %vm2108_vm3 = vcmp.eq.s32.totalorder %v5085_v0, %v2069_v4  ;;  %v5086_v5 = vld [vmem:[%s1973_s26] ss:$0 sm:$0xff]  ;;  %v6591_v7 = vsel %vm2074_vm0, 1.0, %v7037_v8  ;;  %v6594_v33 = vsel %vm2075_vm1, 1.0, %v7037_v8 }
  0xcc   : > { %v6583_v9 = vld [vmem:[%s1919_s1] sm:$0xff]   ;;  %7172 = vst [vmem:[#allocation97_spill] sm:$0xff] %v6591_v7  ;;  %7173 = vst [vmem:[#allocation98_spill] sm:$0xff] %v6594_v33  ;;  %v6597_v0 = vsel %vm2107_vm2, 1.0, %v7037_v8  ;;  %v6600_v11 = vsel %vm2108_vm3, 1.0, %v7037_v8  ;;  %vm2129_vm4 = vcmp.eq.s32.totalorder %v5086_v5, %v6469_v40  ;;  %vm2130_vm5 = vcmp.eq.s32.totalorder %v5086_v5, %v2069_v4  ;;  %s1959_s1 = scalar_lea.vmem %s7176_s25, %s6481_s23  ;;  %s6660_s23 = scalar_lea.vmem [#allocation16], %s1913_s19 }
  0xcd   : > { %7174 = vst [vmem:[#allocation99_spill] sm:$0xff] %v6597_v0  ;;  %7175 = vst [vmem:[#allocation100_spill] sm:$0xff] %v6600_v11  ;;  %v6602_v6 = vld [vmem:[%s1924_s8] sm:$0xff]   ;;  %v6612_v3 = vsel %vm2129_vm4, 1.0, %v7037_v8  ;;  %v6615_v63 = vsel %vm2130_vm5, 1.0, %v7037_v8  ;;  %2061 = vperm.xlu1 %5755, %v2043_v62   ;;  %v7181_v62 = vlaneseq }
  0xce   : > { %v6604_v2 = vld [vmem:[%s1929_s10] sm:$0xff]   ;;  %7178 = vst [vmem:[#allocation101_spill] sm:$0xff] %v6612_v3  ;;  %v2041_v40 = vld [vmem:[%s1941_s12 + $0x8] sm:$0xf]  ;;  %s6678_s10 = smov 0  }
  0xcf   : > { %v2040_v58 = vld [vmem:[%s1941_s12] sm:$0xff]  ;;  %v2079_v4 = vld [vmem:[%s1954_s28 + $0x8] sm:$0x3f]  ;;  %s1966_s8 = scalar_lea.vmem %s7179_s7, %s6588_s24  ;;  %v2046_v56 = vand.u32 127, %v7181_v62 }
  0xd0   : > { %2048 = vperm.xlu0 %5754, %v2040_v58   ;;  %v6618_v5 = vld [vmem:[%s1936_s5] sm:$0x3f]  ;;  %v2081_v59 = vld [vmem:[%s1959_s1 + $0x8] sm:$0x3f]  ;;  %s1970_s26 = scalar_lea.vmem %s7177_s4, %s6588_s24 }
  0xd1   : > { %7180 = vst [vmem:[#allocation102_spill] sm:$0xff] %v6618_v5  ;;  %2087 = vperm.xlu1 %5755, %v2079_v4   ;;  %v2078_v60 = vld [vmem:[%s1954_s28] sm:$0xff] }
  0xd2   : > { %v2080_v8 = vld [vmem:[%s1959_s1] sm:$0xff] }
  0xd3   : > { %v2113_v57 = vld [vmem:[%s1970_s26] sm:$0x3f] }
  0xd4   : > { %2051 = vperm.xlu0 %5754, %v2041_v40   ;;  %v2112_v58 = vld [vmem:[%s1966_s8] sm:$0x3f] }
  0xd5   : > { %2097 = vperm.xlu1 %5755, %v2081_v59  }
  0xd8   : > { %2084 = vperm.xlu0 %5754, %v2078_v60  }
  0xd9   : > { %2121 = vperm.xlu1 %5755, %v2113_v57  }
  0xdc   : > { %2094 = vperm.xlu0 %5754, %v2080_v8  }
  0xe0   : > { %2116 = vperm.xlu0 %5754, %v2112_v58  }
 0x148   : > { %v2059_v30 = vpop.permute.xlu1 %2058 }
 0x149   : > { %vm2063_vm6 = vcmp.eq.s32.totalorder %v2059_v30, %v2046_v56 }
 0x14a   : > { %v6629_v40 = vsel %vm2063_vm6, 1.0, %v7182_v26 }
 0x14c   : > { %v2062_v29 = vpop.permute.xlu1 %2061 }
 0x14d   : > { %vm2064_vm8 = vcmp.eq.s32.totalorder %v2062_v29, %v2046_v56 }
 0x14e   : > { %v6635_v60 = vsel %vm2064_vm8, 1.0, %v7182_v26 }
 0x14f   : > { %v2049_v4 = vpop.permute.xlu0 %2048 }
 0x150   : > { %vm2053_vm7 = vcmp.eq.s32.totalorder %v2049_v4, %v2046_v56  ;;  %v2088_v8 = vpop.permute.xlu1 %2087 }
 0x151   : > { %v6632_v59 = vsel %vm2053_vm7, 1.0, %v7182_v26  ;;  %vm2090_vm10 = vcmp.eq.s32.totalorder %v2088_v8, %v2046_v56 }
 0x152   : > { %v6641_v30 = vsel %vm2090_vm10, 1.0, %v7182_v26 }
 0x153   : > { %v2052_v57 = vpop.permute.xlu0 %2051  ;;  %7183 = vst [vmem:[#allocation103_spill] sm:$0xff] %v6641_v30 }
 0x154   : > { %vm2054_vm9 = vcmp.eq.s32.totalorder %v2052_v57, %v2046_v56  ;;  %v2098_v4 = vpop.permute.xlu1 %2097 }
 0x155   : > { %v6638_v58 = vsel %vm2054_vm9, 1.0, %v7182_v26  ;;  %vm2100_vm12 = vcmp.eq.s32.totalorder %v2098_v4, %v2046_v56 }
 0x156   : > { %v6647_v29 = vsel %vm2100_vm12, 1.0, %v7182_v26 }
 0x157   : > { %v2085_v62 = vpop.permute.xlu0 %2084 }
 0x158   : > { %vm2089_vm11 = vcmp.eq.s32.totalorder %v2085_v62, %v2046_v56  ;;  %v2122_v27 = vpop.permute.xlu1 %2121 }
 0x159   : > { %v6644_v28 = vsel %vm2089_vm11, 1.0, %v7182_v26  ;;  %vm2123_vm14 = vcmp.eq.s32.totalorder %v2122_v27, %v2046_v56 }
 0x15a   : > { %7184 = vst [vmem:[#allocation104_spill] sm:$0xff] %v6644_v28  ;;  %v6653_v8 = vsel %vm2123_vm14, 1.0, %v7182_v26 }
 0x15b   : > { %v2095_v57 = vpop.permute.xlu0 %2094  ;;  %7185 = vst [vmem:[#allocation105_spill] sm:$0xff] %v6653_v8 }
 0x15c   : > { %vm2099_vm13 = vcmp.eq.s32.totalorder %v2095_v57, %v2046_v56 }
 0x15d   : > { %v6650_v23 = vsel %vm2099_vm13, 1.0, %v7182_v26 }
 0x15f   : > { %v2117_v22 = vpop.permute.xlu0 %2116 }
 0x160   : > { %vm2118_vm15 = vcmp.eq.s32.totalorder %v2117_v22, %v2046_v56 }
 0x161   : > { %v6656_v62 = vsel %vm2118_vm15, 1.0, %v7182_v26 }
 0x162   : > { %7186 = vst [vmem:[#allocation106_spill] sm:$0xff] %v6656_v62 }
 0x163 LB: >> { %v7187_v32 = vld [vmem:[#allocation77_spill] sm:$0xff]  ;;  %vm2149_vm0 = vcmask 1045504   ;;  %v6020_v22 = vmov 0.0|0.0   ;;  %v5476_v26 = vpack.c.bf16 %v5933_v61, %v5937_v2  ;;  %vm6021_vm1 = vmmov 1   ;;  %v7195_v28 = vld [vmem:[#allocation104_spill] sm:$0xff]  ;;  %v7196_v30 = vld [vmem:[#allocation103_spill] sm:$0xff]  ;;  %v5933_v61 = vphi %v2039_v61, %v6784_v61   ;;  %s5957_s10 = sphi %s6678_s10, %s2138_s10   ;;  %v5953_v9 = vphi %v6583_v9, %v7220_v9   ;;  %v5949_v10 = vphi %v6585_v10, %v7219_v10   ;;  %v5945_v6 = vphi %v6602_v6, %v6857_v6   ;;  %v5941_v1 = vphi %v2037_v1, %v6860_v1   ;;  %v5937_v2 = vphi %v6604_v2, %v6780_v2  }
 0x164   : >> { %5475 = vmatprep.subr.bf16.mxu0 %v6020_v22  ;;  %5479 = vmatprep.subr.bf16.mxu1 %v6020_v22  ;;  %vm6705_vm2 = vmpackc.low %vm2149_vm0, %vm6021_vm1  ;;  %vm6022_vm3 = vmmov 0   ;;  %v6023_v56 = vmov 0.0   ;;  %vm2145_vm4 = vcmask 113664   ;;  %v7191_v8 = vld [vmem:[#allocation105_spill] sm:$0xff]  ;;  %vm2506_vm5 = vcmask 1043456   ;;  %v7197_v45 = vld [vmem:[#allocation78_spill] sm:$0xff] }
 0x165   : >> { %5291 = vmatprep.mubr.msk.f32.mxu0 %vm6022_vm3, %v6023_v56  ;;  %5298 = vmatprep.mubr.msk.f32.mxu1 %vm6022_vm3, %v6023_v56  ;;  %vm2350_vm6 = vcmask 48128   ;;  %v5483_v4 = vpack.c.bf16 %v5941_v1, %v5945_v6  ;;  %vm6721_vm7 = vmpackc.low %vm2506_vm5, %vm6021_vm1  ;;  %v7194_v3 = vld [vmem:[#allocation101_spill] sm:$0xff]  ;;  %vm2499_vm8 = vcmask 97280   ;;  %v7198_v5 = vld [vmem:[#allocation102_spill] sm:$0xff]  ;;  %vm2666_vm9 = vcmask 64512   ;;  %s2138_s10 = sadd.s32 1, %s5957_s10  }
 0x166   : >> { %5478 = vmatpush3.bf16.msk.msra.mxu0 %vm6705_vm2, %v5476_v26  ;;  %5482 = vmatpush3.bf16.msk.msra.mxu1 %vm6705_vm2, %v5476_v26  ;;  %v7199_v0 = vld [vmem:[#allocation99_spill] sm:$0xff]  ;;  %v7200_v11 = vld [vmem:[#allocation100_spill] sm:$0xff]  ;;  %vm3336_vm10 = vcmask 1041408   ;;  %vm3329_vm12 = vcmask 80896   ;;  %vm3496_vm13 = vcmask 130048   ;;  %vm3766_vm14 = vcmask 162816  }
 0x167   : >> { %5485 = vmatprep.subr.msk.bf16.mxu1 %vm6721_vm7, %v5483_v4  ;;  %vm6820_vm11 = vmpackc.low %vm3336_vm10, %vm6021_vm1  ;;  %v7203_v12 = vld [vmem:[#allocation63_spill] sm:$0xff]  ;;  %v7204_v13 = vld [vmem:[#allocation64_spill] sm:$0xff]  ;;  %vm4130_vm15 = vcmask 195584   ;;  %p2135_p6 = scmp.ge.s32.totalorder %s2138_s10, 3  }
 0x168   : >> { %v7214_v57 = vld [vmem:[#allocation73_spill] sm:$0xff]  ;;  %s7233_s12 = scalar_lea.vmem (%p2135_p6), %s6051_s17, %s6383_s2  ;;  %vm4521_vm1 = vcmask (%p2135_p6), 31744   ;;  %vm6026_vm3 = vmmov (%p2135_p6), 0   ;;  %s7239_s2 = sld [smem:[#allocation62_spill]] (%p2135_p6)  ;;  %v7241_v27 = vld [vmem:[#allocation96_spill] sm:$0xff] (%p2135_p6) }
 0x169   : >> { %v7190_v62 = vld [vmem:[#allocation106_spill] sm:$0xff]  ;;  %5299 = vmatmul.mubr.msk.f32.vlgmr.msra.gmra.mrb[0].mxu1 %vm2145_vm4, %v7191_v8  ;;  %v2317_v8 = vmul.f32 %v6490_v47, %v7198_v5  ;;  %v7232_v47 = vld [vmem:[#allocation89_spill] sm:$0xff] (%p2135_p6)  ;;  %s5174_s21 = sshll.u32 (%p2135_p6), %s6327_s3, 4  ;;  %s4769_s22 = sshll.u32 (%p2135_p6), %s6660_s23, 4  ;;  %s6972_s22 = int_to_ptr.vmem [resolvable:$true] %s4769_s22 }
 0x16a   : >> { %5292 = vmatmul.mubr.msk.f32.vlgmr.msra.gmra.mrb[0].mxu0 %vm2145_vm4, %v7190_v62  ;;  %5488 = vmatpush3.bf16.msk.msra.mxu1 %vm6721_vm7, %v5483_v4  ;;  %s4757_s25 = scalar_lea.sflag (%p2135_p6), [#allocation15], %s1913_s19  ;;  %s5835_s4 = scalar_lea.vmem (%p2135_p6), %s6972_s22, 16 }
 0x16b   : >> { %5303 = vmatprep.mubr.msk.f32.mxu0 %vm2350_vm6, %v7194_v3  ;;  %5310 = vmatprep.mubr.msk.f32.mxu1 %vm2499_vm8, %v7195_v28  ;;  %p5836_p9 = scmp.ne.s32.totalorder (%p2135_p6), %s6972_s22, %s5835_s4  ;;  %p7242_p10 = scmp.ne.s32.totalorder (%p2135_p6), %s7096_s9, 0 }
 0x16c   : >> { %5320 = vmatprep.subr.mxu1 %v7187_v32  ;;  %s6027_s3 = smov (%p2135_p6), [#allocation16]  }
 0x16d   : >> { %5311 = vmatmul.mubr.msk.f32.vlgmr.msra.gmra.mrb[2].mxu1 %vm2499_vm8, %v7196_v30  ;;  %p5837_p12 = pnand (%p2135_p6), %p5836_p9, %p7242_p10  ;;  %s5839_s28 = sshll.u32 (%p2135_p6), %s6027_s3, 4  ;;  %s5840_s28 = int_to_ptr.vmem [resolvable:$false] %s5839_s28 }
 0x16e   : >> { %5321 = vmatpush3.msra.mxu1 %v7187_v32  ;;  %s6970_s24 = scalar_lea.hbm (%p2135_p6), %s7239_s2, %s5174_s21  ;;  %s5841_s5 = scalar_lea.vmem (%p2135_p6), %s5840_s28, 32 }
 0x16f   : >> { %5325 = vmatprep.subr.mxu1 %v6445_v31  ;;  %p5838_p0 = pneg (%p2135_p6), %p5837_p12  ;;  %p5842_p3 = scmp.lt.s32.totalorder (%p2135_p6), %s6972_s22, %s5840_s28 }
 0x170   : > { %p5843_p4 = scmp.lt.s32.totalorder (%p2135_p6), %s5841_s5, %s5835_s4 }
 0x172   : > { %p5844_p7 = por (%p2135_p6), %p5843_p4, %p5842_p3 }
 0x174   : > { %p5845_p8 = pnand (%p2135_p6), %p5844_p7, %p5838_p0 }
 0x23c   : >> { %v2292_v26 = vpop.f32.mrb[0].mxu1 }
 0x23d   : >> { %v2219_v22 = vpop.f32.mrb[0].mxu0  ;;  %v2309_v3 = vmul.f32 %v6488_v46, %v2292_v26  ;;  %v5300_v28 = vpop.f32.mrb[1].mxu1  ;;  %v7231_v46 = vld [vmem:[#allocation88_spill] sm:$0xff] (%p2135_p6) }
 0x23e   : >> { %v2302_v56 = vmul.f32 %v7197_v45, %v2219_v22  ;;  %v5293_v62 = vpop.f32.mrb[1].mxu0 }
 0x240   : >> { %v2310_v33 = vadd.f32 %v2309_v3, %v2302_v56 }
 0x242   : >> { %v2318_v25 = vadd.f32 %v2317_v8, %v2310_v33 }
 0x244   : >> { %v2325_v24 = vadd.f32 %v6492_v48, %v2318_v25  ;;  %v5562_v48 = vpack.c.bf16 (%p2135_p6), %v7232_v47, %v7231_v46 }
 0x246   : >> { %v2327_v30 = vmul.f32 0.70710677, %v2325_v24  ;;  %v2326_v21 = vmul.f32 0.5, %v2325_v24  ;;  %v2442_v24 = vmul.f32 %v5933_v61, %v6498_v51 }
 0x248   : >> { %5757 = verf.f32 %v2327_v30 }
 0x252   : >> { %v5758_v32 = vpop.eup %5757 }
 0x253   : >> { %v2329_v7 = vadd.f32 1.0, %v5758_v32  ;;  %v2441_v32 = vmul.f32 %v5937_v2, %v6498_v51 }
 0x255   : >> { %v2330_v17 = vmul.f32 %v2329_v7, %v2326_v21  ;;  %v6024_v21 = vmov 0  }
 0x256   : >> { %5756 = vset.pattern.permute.xlu0 %v6024_v21 }
 0x257   : >> { %v2337_v20 = vmul.f32 %v6494_v49, %v2330_v17  ;;  %v5312_v17 = vpop.f32.mrb[2].mxu1  ;;  %v4520_v49 = vld [vmem:[%s7233_s12] sm:$0x1] (%p2135_p6) }
 0x259   : >> { %v2344_v22 = vadd.f32 %v6496_v50, %v2337_v20  ;;  %v2576_v20 = vpop.f32.mrb[3].mxu1  ;;  %v6025_v50 = vmov (%p2135_p6), 0.0|0.0  }
 0x25b   : >> { %v2346_v26 = vmul.f32 0.70710677, %v2344_v22  ;;  %v2345_v5 = vmul.f32 0.5, %v2344_v22 }
 0x25d   : >> { %5759 = verf.f32 %v2346_v26 }
 0x267   : >> { %v5760_v45 = vpop.eup %5759 }
 0x268   : >> { %v2348_v62 = vadd.f32 1.0, %v5760_v45 }
 0x26a   : >> { %v2349_v28 = vmul.f32 %v2348_v62, %v2345_v5 }
 0x26c   : >> { %5301 = vmatprep.subr.msk.mxu0 %vm2149_vm0, %v2349_v28 }
 0x26d   : >> { %5302 = vmatpush3.msk.msra.mxu0 %vm2149_vm0, %v2349_v28  ;;  %vm4479_vm0 = vcmask (%p2135_p6), 123904  }
 0x26e   : >> { %5304 = vmatmul.mubr.msk.f32.vlgmr.msra.gmra.mrb[2].mxu0 %vm2350_vm6, %v6615_v63  ;;  %5491 = vmatprep.subr.msk.bf16.mxu0 %vm6721_vm7, %v5483_v4  ;;  %vm4754_vm6 = vcmask (%p2135_p6), 16384  }
 0x26f   : >> { %5494 = vmatpush3.bf16.msk.msra.mxu0 %vm6721_vm7, %v5483_v4  ;;  %5317 = vmatprep.mubr.msk.f32.mxu0 %vm2499_vm8, %v6650_v23  ;;  %v7230_v23 = vld [vmem:[#allocation84_spill] sm:$0xff] (%p2135_p6) }
 0x270   : >> { %5330 = vmatprep.subr.mxu0 %v6457_v36 }
 0x272   : >> { %5318 = vmatmul.mubr.msk.f32.vlgmr.msra.gmra.mrb[4].mxu0 %vm2499_vm8, %v6647_v29 }
 0x273   : >> { %5331 = vmatpush3.msra.mxu0 %v6457_v36 }
 0x341   : >> { %v5305_v25 = vpop.f32.mrb[2].mxu0 }
 0x342   : >> { %v2450_v45 = vmul.f32 %v5305_v25, %v6500_v52  ;;  %v2426_v3 = vpop.f32.mrb[3].mxu0 }
 0x343   : >> { %v2449_v7 = vmul.f32 %v6500_v52, %v2426_v3 }
 0x344   : >> { %v2452_v33 = vadd.f32 %v2450_v45, %v2442_v24 }
 0x345   : >> { %v2451_v5 = vadd.f32 %v2449_v7, %v2441_v32  ;;  %v5319_v30 = vpop.f32.mrb[4].mxu0 }
 0x346   : >> { %v2460_v8 = vadd.f32 %v6502_v53, %v2452_v33  ;;  %v2657_v4 = vpop.f32.mrb[5].mxu0 }
 0x347   : >> { %v2459_v56 = vadd.f32 %v6502_v53, %v2451_v5  ;;  %5322 = vmatprep.mubr.msk.f32.mxu1 %vm2666_vm9, %v2657_v4 }
 0x348   : >> { %v2464_v22 = vmul.f32 0.70710677, %v2460_v8  ;;  %5323 = vmatmul.mubr.msk.f32.vlgmr.msra.gmra.mrb[4].mxu1 %vm2666_vm9, %v5319_v30  ;;  %v2462_v21 = vmul.f32 0.5, %v2460_v8 }
 0x349   : >> { %v2463_v26 = vmul.f32 0.70710677, %v2459_v56  ;;  %5326 = vmatpush3.msra.mxu1 %v6445_v31  ;;  %5327 = vmatprep.mubr.msk.f32.mxu1 %vm2666_vm9, %v2576_v20  ;;  %v2461_v25 = vmul.f32 0.5, %v2459_v56 }
 0x34a   : >> { %5761 = verf.f32 %v2464_v22  ;;  %5342 = vmatprep.subr.mxu1 %v6466_v39 }
 0x34b   : >> { %5763 = verf.f32 %v2463_v26 }
 0x350   : >> { %5328 = vmatmul.mubr.msk.f32.vlgmr.msra.gmra.mrb[4].mxu1 %vm2666_vm9, %v5312_v17 }
 0x351   : >> { %5343 = vmatpush3.msra.mxu1 %v6466_v39 }
 0x352   : >> { %5347 = vmatprep.subr.mxu1 %v6463_v38 }
 0x354   : >> { %v5762_v62 = vpop.eup %5761 }
 0x355   : >> { %v5764_v28 = vpop.eup %5763  ;;  %v2468_v24 = vadd.f32 1.0, %v5762_v62 }
 0x356   : >> { %v2467_v32 = vadd.f32 1.0, %v5764_v28 }
 0x357   : >> { %v2470_v45 = vmul.f32 %v2468_v24, %v2462_v21 }
 0x358   : >> { %v2469_v3 = vmul.f32 %v2467_v32, %v2461_v25 }
 0x359   : >> { %v2478_v20 = vmul.f32 %v6504_v54, %v2470_v45 }
 0x35a   : >> { %v2477_v7 = vmul.f32 %v6504_v54, %v2469_v3 }
 0x35b   : >> { %v2486_v33 = vadd.f32 %v6506_v55, %v2478_v20 }
 0x35c   : >> { %v2485_v17 = vadd.f32 %v6506_v55, %v2477_v7 }
 0x35d   : >> { %v2490_v5 = vmul.f32 0.70710677, %v2486_v33  ;;  %v2488_v28 = vmul.f32 0.5, %v2486_v33 }
 0x35e   : >> { %v2489_v30 = vmul.f32 0.70710677, %v2485_v17  ;;  %v2487_v8 = vmul.f32 0.5, %v2485_v17 }
 0x35f   : >> { %5765 = verf.f32 %v2490_v5 }
 0x360   : >> { %5767 = verf.f32 %v2489_v30 }
 0x369   : >> { %v5766_v4 = vpop.eup %5765 }
 0x36a   : >> { %v5768_v22 = vpop.eup %5767  ;;  %v2494_v56 = vadd.f32 1.0, %v5766_v4 }
 0x36b   : >> { %v2493_v26 = vadd.f32 1.0, %v5768_v22 }
 0x36c   : >> { %v2496_v21 = vmul.f32 %v2494_v56, %v2488_v28 }
 0x36d   : >> { %v2495_v62 = vmul.f32 %v2493_v26, %v2487_v8 }
 0x36e   : >> { %v6784_v61 = vadd.f32 %v5933_v61, %v2496_v21  }
 0x36f   : >> { %v6780_v2 = vadd.f32 %v5937_v2, %v2495_v62  }
 0x371   : >> { %2831 = vperm.xlu0 %5756, %v6780_v2  }
 0x375   : >> { %2836 = vperm.xlu0 %5756, %v6784_v61  }
 0x3f0   : >> { %v2832_v24 = vpop.permute.xlu0 %2831 }
 0x3f1   : >> { %v2845_v45 = vmul.f32 %v6451_v34, %v2832_v24 }
 0x3f4   : >> { %v2837_v25 = vpop.permute.xlu0 %2836 }
 0x3f5   : >> { %v2846_v32 = vmul.f32 %v6451_v34, %v2837_v25 }
 0x423   : >> { %v5329_v3 = vpop.f32.mrb[4].mxu1 }
 0x424   : >> { %v2848_v20 = vadd.f32 %v5329_v3, %v2846_v32  ;;  %v2820_v7 = vpop.f32.mrb[5].mxu1 }
 0x425   : >> { %v2847_v33 = vadd.f32 %v2845_v45, %v2820_v7 }
 0x426   : >> { %v2856_v17 = vadd.f32 %v6454_v35, %v2848_v20 }
 0x427   : >> { %v2855_v5 = vadd.f32 %v6454_v35, %v2847_v33 }
 0x428   : >> { %v2860_v30 = vmul.f32 0.70710677, %v2856_v17  ;;  %v2858_v28 = vmul.f32 0.5, %v2856_v17 }
 0x429   : >> { %v2859_v4 = vmul.f32 0.70710677, %v2855_v5  ;;  %v2857_v56 = vmul.f32 0.5, %v2855_v5 }
 0x42a   : >> { %5769 = verf.f32 %v2860_v30 }
 0x42b   : >> { %5771 = verf.f32 %v2859_v4 }
 0x434   : >> { %v5770_v22 = vpop.eup %5769 }
 0x435   : >> { %v5772_v8 = vpop.eup %5771  ;;  %v2864_v26 = vadd.f32 1.0, %v5770_v22 }
 0x436   : >> { %v2863_v62 = vadd.f32 1.0, %v5772_v8 }
 0x437   : >> { %v2866_v24 = vmul.f32 %v2864_v26, %v2858_v28 }
 0x438   : >> { %v2865_v21 = vmul.f32 %v2863_v62, %v2857_v56 }
 0x43a   : >> { %5332 = vmatprep.mubr.msk.f32.mxu0 %vm2666_vm9, %v2865_v21  ;;  %v5501_v21 = vpack.c.bf16 %v6478_v43, %v6475_v42 }
 0x43b   : >> { %5333 = vmatmul.mubr.msk.f32.vlgmr.msra.gmra.mrb[6].mxu0 %vm2666_vm9, %v2866_v24  ;;  %v5507_v24 = vpack.c.bf16 %v5949_v10, %v5953_v9 }
 0x43c   : >> { %5339 = vmatprep.mubr.msk.f32.mxu0 %vm2145_vm4, %v7199_v0 }
 0x50e   : >> { %v5334_v25 = vpop.f32.mrb[6].mxu0 }
 0x50f   : >> { %v2951_v32 = vadd.f32 %v5334_v25, %v6460_v37  ;;  %v2945_v45 = vpop.f32.mrb[7].mxu0 }
 0x510   : >> { %v2946_v3 = vadd.f32 %v6460_v37, %v2945_v45 }
 0x511   : >> { %v2957_v20 = vmul.f32 0.70710677, %v2951_v32  ;;  %v2955_v5 = vmul.f32 0.5, %v2951_v32 }
 0x512   : >> { %v2956_v7 = vmul.f32 0.70710677, %v2946_v3  ;;  %v2954_v4 = vmul.f32 0.5, %v2946_v3 }
 0x513   : >> { %5773 = verf.f32 %v2957_v20 }
 0x514   : >> { %5775 = verf.f32 %v2956_v7 }
 0x51d   : >> { %v5774_v33 = vpop.eup %5773 }
 0x51e   : >> { %v5776_v17 = vpop.eup %5775  ;;  %v2961_v30 = vadd.f32 1.0, %v5774_v33 }
 0x51f   : >> { %v2960_v22 = vadd.f32 1.0, %v5776_v17 }
 0x520   : >> { %v2963_v8 = vmul.f32 %v2961_v30, %v2955_v5 }
 0x521   : >> { %v2962_v26 = vmul.f32 %v2960_v22, %v2954_v4 }
 0x523   : >> { %v5495_v56 = vpack.c.bf16 %v2963_v8, %v2962_v26 }
 0x525   : >> { %5497 = vmatprep.subr.msk.bf16.mxu0 %vm6705_vm2, %v5495_v56 }
 0x526   : >> { %5500 = vmatpush3.bf16.msk.msra.mxu0 %vm6705_vm2, %v5495_v56 }
 0x527   : >> { %5503 = vmatprep.subr.msk.bf16.mxu0 %vm6721_vm7, %v5501_v21 }
 0x529   : >> { %5340 = vmatmul.mubr.msk.f32.vlgmr.msra.gmra.mrb[8].mxu0 %vm2145_vm4, %v7200_v11 }
 0x52a   : >> { %5506 = vmatpush3.bf16.msk.msra.mxu0 %vm6721_vm7, %v5501_v21 }
 0x52b   : >> { %5509 = vmatprep.subr.msk.bf16.mxu0 %vm6820_vm11, %v5507_v24 }
 0x5fc   : >> { %v5341_v62 = vpop.f32.mrb[8].mxu0 }
 0x5fd   : >> { %v3039_v28 = vpop.f32.mrb[9].mxu0 }
 0x5fe   : >> { %5344 = vmatprep.mubr.msk.f32.mxu1 %vm2666_vm9, %v3039_v28 }
 0x5ff   : >> { %5345 = vmatmul.mubr.msk.f32.vlgmr.msra.gmra.mrb[6].mxu1 %vm2666_vm9, %v5341_v62  ;;  %v5519_v62 = vpack.c.bf16 %v6397_v15, %v6394_v14  ;;  %v7228_v14 = vld [vmem:[#allocation90_spill] sm:$0xff] (%p2135_p6) }
 0x600   : >> { %5348 = vmatpush3.msra.mxu1 %v6463_v38  ;;  %5349 = vmatprep.mubr.msk.f32.mxu1 %vm2666_vm9, %v5945_v6 }
 0x601   : >> { %5515 = vmatprep.subr.msk.bf16.mxu1 %vm6820_vm11, %v5507_v24 }
 0x607   : >> { %5350 = vmatmul.mubr.msk.f32.vlgmr.msra.gmra.mrb[6].mxu1 %vm2666_vm9, %v5941_v1 }
 0x608   : >> { %5518 = vmatpush3.bf16.msk.msra.mxu1 %vm6820_vm11, %v5507_v24  ;;  %5370 = vmatprep.mubr.msk.f32.mxu1 %vm3329_vm12, %v6629_v40 }
 0x60b   : >> { %5371 = vmatmul.mubr.msk.f32.vlgmr.msra.gmra.mrb[8].mxu1 %vm3329_vm12, %v6635_v60 }
 0x6da   : >> { %v5351_v32 = vpop.f32.mrb[6].mxu1 }
 0x6db   : >> { %v3216_v45 = vadd.f32 %v5351_v32, %v6472_v41  ;;  %v3200_v3 = vpop.f32.mrb[7].mxu1 }
 0x6dc   : >> { %v3215_v20 = vadd.f32 %v6472_v41, %v3200_v3 }
 0x6dd   : >> { %v3220_v7 = vmul.f32 0.70710677, %v3216_v45  ;;  %v3218_v8 = vmul.f32 0.5, %v3216_v45 }
 0x6de   : >> { %v3219_v33 = vmul.f32 0.70710677, %v3215_v20  ;;  %v3217_v4 = vmul.f32 0.5, %v3215_v20  ;;  %v5372_v28 = vpop.f32.mrb[8].mxu1 }
 0x6df   : >> { %5777 = verf.f32 %v3220_v7  ;;  %v3487_v21 = vpop.f32.mrb[9].mxu1 }
 0x6e0   : >> { %5779 = verf.f32 %v3219_v33 }
 0x6e9   : >> { %v5778_v17 = vpop.eup %5777 }
 0x6ea   : >> { %v5780_v5 = vpop.eup %5779  ;;  %v3224_v30 = vadd.f32 1.0, %v5778_v17 }
 0x6eb   : >> { %v3223_v22 = vadd.f32 1.0, %v5780_v5 }
 0x6ec   : >> { %v3226_v56 = vmul.f32 %v3224_v30, %v3218_v8 }
 0x6ed   : >> { %v3225_v26 = vmul.f32 %v3223_v22, %v3217_v4 }
 0x6ef   : >> { %5356 = vmatprep.mubr.msk.f32.mxu0 %vm2499_vm8, %v3225_v26 }
 0x6f0   : >> { %5357 = vmatmul.mubr.msk.f32.vlgmr.msra.gmra.mrb[10].mxu0 %vm2499_vm8, %v3226_v56 }
 0x6f1   : >> { %5512 = vmatpush3.bf16.msk.msra.mxu0 %vm6820_vm11, %v5507_v24  ;;  %5363 = vmatprep.mubr.msk.f32.mxu0 %vm3329_vm12, %v6632_v59  ;;  %v5523_v24 = vpack.c.bf16 %v7204_v13, %v7203_v12 }
 0x6f2   : >> { %5520 = vmatprep.subr.bf16.mxu0 %v5519_v62 }
 0x6f4   : >> { %5364 = vmatmul.mubr.msk.f32.vlgmr.msra.gmra.mrb[12].mxu0 %vm3329_vm12, %v6638_v58 }
 0x6f5   : >> { %5522 = vmatpush3.bf16.msra.mxu0 %v5519_v62  ;;  %5377 = vmatprep.mubr.msk.f32.mxu0 %vm3496_vm13, %v3487_v21  ;;  %v7205_v21 = vld [vmem:[#allocation66_spill] sm:$0xff] }
 0x6f6   : >> { %5524 = vmatprep.subr.bf16.mxu0 %v5523_v24 }
 0x6f8   : >> { %5378 = vmatmul.mubr.msk.f32.vlgmr.msra.gmra.mrb[14].mxu0 %vm3496_vm13, %v5372_v28  ;;  %v5527_v28 = vpack.c.bf16 %v6409_v19, %v6406_v18  ;;  %v7229_v18 = vld [vmem:[#allocation81_spill] sm:$0xff] (%p2135_p6) }
 0x6f9   : >> { %5526 = vmatpush3.bf16.msra.mxu0 %v5523_v24 }
 0x6fa   : >> { %5387 = vmatprep.subr.mxu0 %v6400_v16  ;;  %5528 = vmatprep.subr.bf16.mxu1 %v5527_v28 }
 0x6fb   : >> { %5530 = vmatpush3.bf16.msra.mxu1 %v5527_v28  ;;  %v7208_v28 = vld [vmem:[#allocation67_spill] sm:$0xff] }
 0x6fc   : >> { %5396 = vmatprep.subr.msk.mxu1 %vm2506_vm5, %v7205_v21 }
 0x6ff   : >> { %5397 = vmatpush3.msk.msra.mxu1 %vm2506_vm5, %v7205_v21 }
 0x7c3   : >> { %v5358_v25 = vpop.f32.mrb[10].mxu0 }
 0x7c4   : >> { %v3314_v32 = vadd.f32 %v5358_v25, %v6484_v44  ;;  %v3308_v45 = vpop.f32.mrb[11].mxu0  ;;  %v7206_v25 = vld [vmem:[#allocation65_spill] sm:$0xff] }
 0x7c5   : >> { %v3309_v3 = vadd.f32 %v6484_v44, %v3308_v45 }
 0x7c6   : >> { %v3320_v20 = vmul.f32 0.70710677, %v3314_v32  ;;  %v3318_v4 = vmul.f32 0.5, %v3314_v32 }
 0x7c7   : >> { %v3319_v7 = vmul.f32 0.70710677, %v3309_v3  ;;  %v5365_v33 = vpop.f32.mrb[12].mxu0  ;;  %v3317_v8 = vmul.f32 0.5, %v3309_v3 }
 0x7c8   : >> { %5781 = verf.f32 %v3320_v20  ;;  %v3406_v17 = vpop.f32.mrb[13].mxu0 }
 0x7c9   : >> { %5783 = verf.f32 %v3319_v7  ;;  %5384 = vmatprep.mubr.msk.f32.mxu0 %vm3496_vm13, %v3406_v17 }
 0x7ca   : >> { %5385 = vmatmul.mubr.msk.f32.vlgmr.msra.gmra.mrb[14].mxu0 %vm3496_vm13, %v5365_v33 }
 0x7cb   : >> { %5388 = vmatpush3.msra.mxu0 %v6400_v16 }
 0x7d2   : >> { %v5782_v5 = vpop.eup %5781 }
 0x7d3   : >> { %v5784_v30 = vpop.eup %5783  ;;  %v3324_v22 = vadd.f32 1.0, %v5782_v5 }
 0x7d4   : >> { %v3323_v26 = vadd.f32 1.0, %v5784_v30 }
 0x7d5   : >> { %v3326_v56 = vmul.f32 %v3324_v22, %v3318_v4 }
 0x7d6   : >> { %v3325_v62 = vmul.f32 %v3323_v26, %v3317_v8 }
 0x7d7   : >> { %v6860_v1 = vadd.f32 %v5941_v1, %v3326_v56   ;;  %v7207_v56 = vld [vmem:[#allocation97_spill] sm:$0xff] }
 0x7d8   : >> { %v6857_v6 = vadd.f32 %v5945_v6, %v3325_v62  }
 0x7da   : >> { %5389 = vmatprep.mubr.msk.f32.mxu0 %vm2666_vm9, %v6857_v6 }
 0x7db   : >> { %5390 = vmatmul.mubr.msk.f32.vlgmr.msra.gmra.mrb[14].mxu0 %vm2666_vm9, %v6860_v1 }
 0x8ae   : >> { %v5391_v24 = vpop.f32.mrb[14].mxu0 }
 0x8af   : >> { %v3749_v32 = vadd.f32 %v5391_v24, %v7206_v25  ;;  %v3731_v45 = vpop.f32.mrb[15].mxu0 }
 0x8b0   : >> { %v3748_v3 = vadd.f32 %v7206_v25, %v3731_v45 }
 0x8b1   : >> { %v3753_v20 = vmul.f32 0.70710677, %v3749_v32  ;;  %v3751_v22 = vmul.f32 0.5, %v3749_v32 }
 0x8b2   : >> { %v3752_v7 = vmul.f32 0.70710677, %v3748_v3  ;;  %v3750_v30 = vmul.f32 0.5, %v3748_v3 }
 0x8b3   : >> { %5785 = verf.f32 %v3753_v20 }
 0x8b4   : >> { %5787 = verf.f32 %v3752_v7 }
 0x8bd   : >> { %v5786_v33 = vpop.eup %5785 }
 0x8be   : >> { %v5788_v17 = vpop.eup %5787  ;;  %v3757_v5 = vadd.f32 1.0, %v5786_v33 }
 0x8bf   : >> { %v3756_v4 = vadd.f32 1.0, %v5788_v17 }
 0x8c0   : >> { %v3759_v26 = vmul.f32 %v3757_v5, %v3751_v22 }
 0x8c1   : >> { %v3758_v8 = vmul.f32 %v3756_v4, %v3750_v30 }
 0x8c3   : >> { %5398 = vmatprep.mubr.msk.f32.mxu1 %vm3766_vm14, %v3758_v8 }
 0x8c4   : >> { %5399 = vmatmul.mubr.msk.f32.vlgmr.msra.gmra.mrb[10].mxu1 %vm3766_vm14, %v3759_v26  ;;  %v7209_v26 = vld [vmem:[#allocation70_spill] sm:$0xff] }
 0x8c5   : >> { %5405 = vmatprep.mubr.msk.f32.mxu1 %vm2499_vm8, %v7207_v56  ;;  %v7210_v56 = vld [vmem:[#allocation71_spill] sm:$0xff] }
 0x8c6   : >> { %v5537_v11 = vpack.c.bf16 %v7210_v56, %v7209_v26 }
 0x997   : >> { %v5400_v62 = vpop.f32.mrb[10].mxu1 }
 0x998   : >> { %v3848_v24 = vadd.f32 %v5400_v62, %v7208_v28  ;;  %v3842_v45 = vpop.f32.mrb[11].mxu1  ;;  %v7212_v62 = vld [vmem:[#allocation68_spill] sm:$0xff] }
 0x999   : >> { %v3843_v20 = vadd.f32 %v7208_v28, %v3842_v45 }
 0x99a   : >> { %v3854_v7 = vmul.f32 0.70710677, %v3848_v24  ;;  %v3852_v33 = vmul.f32 0.5, %v3848_v24  ;;  %v7213_v24 = vld [vmem:[#allocation69_spill] sm:$0xff] }
 0x99b   : >> { %v3853_v0 = vmul.f32 0.70710677, %v3843_v20  ;;  %v3851_v5 = vmul.f32 0.5, %v3843_v20  ;;  %v5541_v45 = vpack.c.bf16 %v7213_v24, %v7212_v62 }
 0x99c   : >> { %5789 = verf.f32 %v3854_v7 }
 0x99d   : >> { %5791 = verf.f32 %v3853_v0  ;;  %v7211_v0 = vld [vmem:[#allocation98_spill] sm:$0xff] }
 0x9a6   : >> { %v5790_v3 = vpop.eup %5789 }
 0x9a7   : >> { %v5792_v32 = vpop.eup %5791  ;;  %v3858_v17 = vadd.f32 1.0, %v5790_v3  ;;  %v7215_v3 = vld [vmem:[#allocation74_spill] sm:$0xff] }
 0x9a8   : >> { %v3857_v30 = vadd.f32 1.0, %v5792_v32  ;;  %v7216_v32 = vld [vmem:[#allocation75_spill] sm:$0xff] }
 0x9a9   : >> { %v3860_v4 = vmul.f32 %v3858_v17, %v3852_v33  ;;  %v7217_v17 = vld [vmem:[#allocation72_spill] sm:$0xff] }
 0x9aa   : >> { %v3859_v22 = vmul.f32 %v3857_v30, %v3851_v5 }
 0x9ac   : >> { %v5531_v8 = vpack.c.bf16 %v3860_v4, %v3859_v22 }
 0x9ae   : >> { %5533 = vmatprep.subr.msk.bf16.mxu1 %vm6721_vm7, %v5531_v8 }
 0x9af   : >> { %5536 = vmatpush3.bf16.msk.msra.mxu1 %vm6721_vm7, %v5531_v8 }
 0x9b0   : >> { %5538 = vmatprep.subr.bf16.mxu1 %v5537_v11 }
 0x9b2   : >> { %5406 = vmatmul.mubr.msk.f32.vlgmr.msra.gmra.mrb[12].mxu1 %vm2499_vm8, %v7211_v0 }
 0x9b3   : >> { %5540 = vmatpush3.bf16.msra.mxu1 %v5537_v11  ;;  %v5545_v11 = vpack.c.bf16 %v7215_v3, %v7214_v57  ;;  %v7218_v3 = vld [vmem:[#allocation76_spill] sm:$0xff] }
 0x9b4   : >> { %5542 = vmatprep.subr.bf16.mxu1 %v5541_v45 }
 0x9b5   : >> { %5546 = vmatprep.subr.bf16.mxu0 %v5545_v11 }
 0x9b6   : >> { %5548 = vmatpush3.bf16.msra.mxu0 %v5545_v11 }
 0x9b7   : >> { %5426 = vmatprep.subr.mxu0 %v7216_v32 }
 0x9ba   : >> { %5427 = vmatpush3.msra.mxu0 %v7216_v32 }
 0xa85   : >> { %v5407_v20 = vpop.f32.mrb[12].mxu1 }
 0xa86   : >> { %v3936_v7 = vpop.f32.mrb[13].mxu1 }
 0xa87   : >> { %5412 = vmatprep.mubr.msk.f32.mxu1 %vm3496_vm13, %v3936_v7 }
 0xa88   : >> { %5413 = vmatmul.mubr.msk.f32.vlgmr.msra.gmra.mrb[14].mxu1 %vm3496_vm13, %v5407_v20 }
 0xa89   : >> { %5544 = vmatpush3.bf16.msra.mxu1 %v5541_v45  ;;  %5419 = vmatprep.mubr.msk.f32.mxu1 %vm3496_vm13, %v5953_v9 }
 0xa90   : >> { %5420 = vmatmul.mubr.msk.f32.vlgmr.msra.gmra.mrb[14].mxu1 %vm3496_vm13, %v5949_v10 }
 0xb63   : >> { %v5421_v33 = vpop.f32.mrb[14].mxu1 }
 0xb64   : >> { %v4113_v5 = vadd.f32 %v5421_v33, %v7217_v17  ;;  %v4097_v30 = vpop.f32.mrb[15].mxu1 }
 0xb65   : >> { %v4112_v4 = vadd.f32 %v7217_v17, %v4097_v30 }
 0xb66   : >> { %v4117_v22 = vmul.f32 0.70710677, %v4113_v5  ;;  %v4115_v45 = vmul.f32 0.5, %v4113_v5 }
 0xb67   : >> { %v4116_v8 = vmul.f32 0.70710677, %v4112_v4  ;;  %v4114_v62 = vmul.f32 0.5, %v4112_v4 }
 0xb68   : >> { %5793 = verf.f32 %v4117_v22 }
 0xb69   : >> { %5795 = verf.f32 %v4116_v8 }
 0xb72   : >> { %v5794_v26 = vpop.eup %5793 }
 0xb73   : >> { %v5796_v56 = vpop.eup %5795  ;;  %v4121_v0 = vadd.f32 1.0, %v5794_v26 }
 0xb74   : >> { %v4120_v24 = vadd.f32 1.0, %v5796_v56 }
 0xb75   : >> { %v4123_v7 = vmul.f32 %v4121_v0, %v4115_v45 }
 0xb76   : >> { %v4122_v20 = vmul.f32 %v4120_v24, %v4114_v62 }
 0xb78   : >> { %5428 = vmatprep.mubr.msk.f32.mxu0 %vm4130_vm15, %v4122_v20  ;;  %v7223_v20 = vld [vmem:[#allocation82_spill] sm:$0xff] (%p2135_p6) }
 0xb79   : >> { %5429 = vmatmul.mubr.msk.f32.vlgmr.msra.gmra.mrb[16].mxu0 %vm4130_vm15, %v4123_v7  ;;  %v7224_v7 = vld [vmem:[#allocation83_spill] sm:$0xff] (%p2135_p6) }
 0xc4c   : >> { %v5430_v57 = vpop.f32.mrb[16].mxu0 }
 0xc4d   : >> { %v4209_v11 = vadd.f32 %v5430_v57, %v7218_v3  ;;  %v4203_v33 = vpop.f32.mrb[17].mxu0  ;;  %v5553_v57 = vpack.c.bf16 (%p2135_p6), %v7224_v7, %v7223_v20 }
 0xc4e   : >> { %v4204_v30 = vadd.f32 %v7218_v3, %v4203_v33  ;;  %v7226_v33 = vld [vmem:[#allocation86_spill] sm:$0xff] (%p2135_p6) }
 0xc4f   : >> { %v4215_v12 = vmul.f32 0.70710677, %v4209_v11  ;;  %v4213_v4 = vmul.f32 0.5, %v4209_v11  ;;  %v7225_v11 = vld [vmem:[#allocation85_spill] sm:$0xff] (%p2135_p6)  ;;  %5554 = vmatprep.subr.bf16.mxu1 (%p2135_p6), %v5553_v57 }
 0xc50   : >> { %v4214_v22 = vmul.f32 0.70710677, %v4204_v30  ;;  %v4212_v5 = vmul.f32 0.5, %v4204_v30  ;;  %v5557_v30 = vpack.c.bf16 (%p2135_p6), %v7226_v33, %v7225_v11  ;;  %5556 = vmatpush3.bf16.msra.mxu1 (%p2135_p6), %v5553_v57 }
 0xc51   : >> { %5797 = verf.f32 %v4215_v12  ;;  %v7221_v12 = vld [vmem:[#allocation79_spill] sm:$0xff] (%p2135_p6) }
 0xc52   : >> { %5799 = verf.f32 %v4214_v22  ;;  %v7227_v22 = vmov (%p2135_p6), 0.0  }
 0xc53   : > { %5452 = vmatprep.subr.mxu1 (%p2135_p6), %v7227_v22 }
 0xc5b   : >> { %v5798_v8 = vpop.eup %5797 }
 0xc5c   : >> { %v5800_v26 = vpop.eup %5799  ;;  %v4219_v56 = vadd.f32 1.0, %v5798_v8 }
 0xc5d   : >> { %v4218_v13 = vadd.f32 1.0, %v5800_v26  ;;  %2137 = sbr.rel (!%p2135_p6) target bundleno = 355 (0x163), region = 396 }
 0xc5e   : >> { %v4221_v62 = vmul.f32 %v4219_v56, %v4213_v4  ;;  %v7234_v4 = vld [vmem:[#allocation87_spill] sm:$0xff] (%p2135_p6) }
 0xc5f   : >> { %v4220_v0 = vmul.f32 %v4218_v13, %v4212_v5  ;;  %v7222_v13 = vld [vmem:[#allocation80_spill] sm:$0xff] (%p2135_p6) }
 0xc60   : >> { %v4223_v24 = vadd.f32 %v5949_v10, %v4221_v62  }
 0xc61   : >> { %v4222_v45 = vadd.f32 %v5953_v9, %v4220_v0  }
 0xc62   : >> { %v7219_v10 = vmov %v4223_v24 }
 0xc63   : >> { %v7220_v9 = vmov %v4222_v45  ;;  %5435 = vmatprep.mubr.msk.f32.mxu0 (%p2135_p6), %vm3496_vm13, %v4222_v45  ;;  %5442 = vmatprep.mubr.msk.f32.mxu1 (%p2135_p6), %vm3496_vm13, %v4222_v45 }
 0xc64   : > { %v5549_v9 = vpack.c.bf16 %v7222_v13, %v7221_v12  ;;  %5443 = vmatmul.mubr.msk.f32.vlgmr.msra.gmra.mrb[0].mxu1 %vm3496_vm13, %v4223_v24 }
 0xc65   : > { %5453 = vmatpush3.msk.msra.mxu1 %vm2506_vm5, %v7228_v14  ;;  %5454 = vmatprep.mubr.msk.f32.mxu1 %vm6026_vm3, %v7227_v22  ;;  %vm4676_vm5 = vcmask 244736  }
 0xc66   : > { %5550 = vmatprep.subr.bf16.mxu0 %v5549_v9  ;;  %5564 = vmatprep.subr.bf16.mxu1 %v6025_v50 }
 0xc67   : > { %5552 = vmatpush3.bf16.msra.mxu0 %v5549_v9 }
 0xc68   : > { %5558 = vmatprep.subr.bf16.mxu0 %v5557_v30  ;;  %5455 = vmatmul.mubr.msk.f32.vlgmr.msra.gmra.mrb[2].mxu1 %vm4521_vm1, %v4520_v49 }
 0xc69   : > { %5472 = vmatprep.mubr.msk.f32.mxu1 %vm6026_vm3, %v7227_v22 }
 0xc6a   : > { %5436 = vmatmul.mubr.msk.f32.vlgmr.msra.gmra.mrb[0].mxu0 %vm3496_vm13, %v4223_v24 }
 0xc6b   : > { %5560 = vmatpush3.bf16.msra.mxu0 %v5557_v30  ;;  %5449 = vmatprep.mubr.msk.f32.mxu0 %vm3496_vm13, %v4222_v45 }
 0xc6c   : > { %5561 = vmatprep.subr.bf16.mxu0 %v6025_v50 }
 0xc6e   : > { %5450 = vmatmul.mubr.msk.f32.vlgmr.msra.gmra.mrb[2].mxu0 %vm3496_vm13, %v4223_v24 }
 0xc6f   : > { %5563 = vmatpush3.bf16.msra.mxu0 %v5562_v48  ;;  %5461 = vmatprep.mubr.msk.f32.mxu0 %vm6026_vm3, %v7227_v22 }
 0xd37   : > { %v5444_v16 = vpop.f32.mrb[0].mxu1 }
 0xd38   : > { %v4390_v31 = vadd.f32 %v5444_v16, %v7230_v23  ;;  %v4384_v35 = vpop.f32.mrb[1].mxu1  ;;  %v7235_v16 = vld [vmem:[#allocation92_spill] sm:$0xff] }
 0xd39   : > { %v4385_v37 = vadd.f32 %v7230_v23, %v4384_v35  ;;  %v7237_v23 = vld [vmem:[#allocation94_spill] sm:$0xff] }
 0xd3b   : > { %v4595_v14 = vpop.f32.mrb[2].mxu1 }
 0xd3d   : > { %v5437_v15 = vpop.f32.mrb[0].mxu0 }
 0xd3e   : > { %v4309_v19 = vadd.f32 %v5437_v15, %v7229_v18  ;;  %v4303_v34 = vpop.f32.mrb[1].mxu0  ;;  %v5456_v15 = vpop.f32.mrb[3].mxu1 }
 0xd3f   : > { %v4304_v36 = vadd.f32 %v7229_v18, %v4303_v34  ;;  %v7236_v18 = vld [vmem:[#allocation93_spill] sm:$0xff] }
 0xd40   : > { %v4475_v38 = vmul.f32 %v4390_v31, %v4309_v19  ;;  %v5565_v19 = vpack.c.bf16 %v7236_v18, %v7235_v16  ;;  %v7238_v31 = vld [vmem:[#allocation95_spill] sm:$0xff] }
 0xd41   : > { %v4474_v39 = vmul.f32 %v4385_v37, %v4304_v36  ;;  %v5451_v43 = vpop.f32.mrb[2].mxu0  ;;  %v5568_v34 = vpack.c.bf16 %v7238_v31, %v7237_v23 }
 0xd42   : > { %v4480_v41 = vsel %vm4479_vm0, %v4475_v38, 0.0  ;;  %v4465_v44 = vpop.f32.mrb[3].mxu0  ;;  %v4471_v56 = vadd.f32 %v5451_v43, %v7234_v4  ;;  %5566 = vmatpush3.bf16.msra.mxu1 %v5565_v19  ;;  %v7240_v38 = vld [vmem:[#allocation91_spill] sm:$0xff] }
 0xd43   : > { %4481 = vadd.xlane.f32.xlu0 %v4480_v41  ;;  %v4476_v42 = vsel %vm3496_vm13, %v4474_v39, 0.0  ;;  %v4466_v5 = vadd.f32 %v7234_v4, %v4465_v44  ;;  %5567 = vmatprep.subr.bf16.mxu1 %v6025_v50 }
 0xd46   : > { %5570 = vmatpush3.bf16.msk.msra.mxu1 %vm6705_vm2, %v5568_v34 }
 0xd47   : > { %4477 = vadd.xlane.f32.xlu0 %v4476_v42 }
 0xdd0   : > { %v4482_v51 = vpop.xlane.xlu0 %4481 }
 0xdd1   : > { %v4484_v52 = vsel %vm3336_vm10, %v4482_v51, -inf }
 0xdd4   : > { %v4478_v53 = vpop.xlane.xlu0 %4477 }
 0xdd5   : > { %v4485_v54 = vmax.f32 %v4478_v53, %v4484_v52 }
 0xdd7   : > { %v4486_v55 = vrot.slane %v4485_v54, 4 }
 0xdd9   : > { %v4487_v61 = vmax.f32 %v4485_v54, %v4486_v55 }
 0xddb   : > { %v4488_v63 = vrot.slane %v4487_v61, 2 }
 0xddd   : > { %v4489_v1 = vmax.f32 %v4487_v61, %v4488_v63 }
 0xddf   : > { %v4490_v2 = vrot.slane %v4489_v1, 1 }
 0xde1   : > { %v4491_v6 = vmax.f32 %v4489_v1, %v4490_v2 }
 0xde3   : > { %v4492_v10 = vsub.f32 %v4478_v53, %v4491_v6  ;;  %v4493_v40 = vsub.f32 %v4482_v51, %v4491_v6 }
 0xde5   : > { %v4494_v59 = vmul.f32 1.442695, %v4492_v10  ;;  %v4496_v60 = vmul.f32 1.442695, %v4493_v40 }
 0xde7   : > { %5801 = vpow2.f32 %v4494_v59 }
 0xde8   : > { %5803 = vpow2.f32 %v4496_v60 }
 0xdf1   : > { %v5802_v58 = vpop.eup %5801 }
 0xdf2   : > { %v5804_v29 = vpop.eup %5803 }
 0xdf3   : > { %v4498_v21 = vsel %vm3336_vm10, %v5804_v29, 0.0 }
 0xdf4   : > { %v4499_v25 = vadd.f32 %v5802_v58, %v4498_v21 }
 0xdf6   : > { %v4500_v28 = vrot.slane %v4499_v25, 4 }
 0xdf8   : > { %v4501_v32 = vadd.f32 %v4500_v28, %v4499_v25 }
 0xdfa   : > { %v4502_v17 = vrot.slane %v4501_v32, 2 }
 0xdfc   : > { %v4503_v3 = vadd.f32 %v4502_v17, %v4501_v32 }
 0xdfe   : > { %v4504_v8 = vrot.slane %v4503_v3, 1 }
 0xe00   : > { %v4505_v26 = vadd.f32 %v4504_v8, %v4503_v3 }
 0xe02   : > { %5805 = vrcp.f32 %v4505_v26 }
 0xe0c   : > { %v5806_v62 = vpop.eup %5805 }
 0xe0d   : > { %v4508_v0 = vmul.f32 %v5806_v62, %v5804_v29  ;;  %v4507_v24 = vmul.f32 %v5806_v62, %v5802_v58 }
 0xe0f   : > { %v4510_v45 = vmul.f32 %v4508_v0, %v4471_v56  ;;  %v4509_v12 = vmul.f32 %v4507_v24, %v4466_v5 }
 0xe11   : > { %v4512_v13 = vsel %vm4479_vm0, %v4510_v45, 0.0  ;;  %v4511_v9 = vsel %vm3496_vm13, %v4509_v12, 0.0 }
 0xe12   : > { %v4513_v20 = vadd.f32 %v4512_v13, %v4511_v9 }
 0xe14   : > { %v4514_v7 = vrot.slane %v4513_v20, 4 }
 0xe16   : > { %v4515_v57 = vadd.f32 %v4514_v7, %v4513_v20 }
 0xe18   : > { %v4516_v11 = vrot.slane %v4515_v57, 2 }
 0xe1a   : > { %v4517_v33 = vadd.f32 %v4516_v11, %v4515_v57 }
 0xe1c   : > { %v4518_v30 = vrot.slane %v4517_v33, 1 }
 0xe1e   : > { %v4519_v22 = vadd.f32 %v4518_v30, %v4517_v33 }
 0xe20   : > { %5462 = vmatmul.mubr.msk.f32.vlgmr.msra.gmra.mrb[4].mxu0 %vm3496_vm13, %v4519_v22 }
 0xef3   : > { %v4668_v35 = vpop.f32.mrb[4].mxu0 }
 0xef4   : > { %v4669_v36 = vadd.f32 %v4668_v35, %v4595_v14  ;;  %v5463_v37 = vpop.f32.mrb[5].mxu0 }
 0xef6   : > { %v4672_v39 = vadd.f32 %v4669_v36, %v7240_v38 }
 0xef8   : > { %vm4673_vm4 = vcmp.ge.f32.partialorder %v4672_v39, 0.0  ;;  %v4674_v41 = vmul.f32 0.01, %v4672_v39 }
 0xefa   : > { %v4675_v42 = vsel %vm4673_vm4, %v4672_v39, %v4674_v41 }
 0xefb   : > { %5473 = vmatmul.mubr.msk.f32.vlgmr.msra.gmra.mrb[4].mxu1 %vm4676_vm5, %v4675_v42 }
 0xfce   : > { %v4750_v43 = vpop.f32.mrb[4].mxu1 }
 0xfcf   : > { %v4751_v44 = vadd.f32 %v4750_v43, %v7241_v27  ;;  %v5474_v46 = vpop.f32.mrb[5].mxu1 }
 0xfd1   : > { %4755 = vst.msk [vmem:[%s6660_s23] sm:$0x1] %vm4754_vm6, %v4751_v44 }
 0xfd2   : > { %5848 = shalt.err (!%p5845_p8)
}
 0xfd3   : > { %s5849_s7 = scalar_lea.hbm %s6970_s24, 16  ;;  %s5853_s1 = scalar_lea.hbm %s7239_s2, 32 }
 0xfd4   : > { %p5850_p11 = scmp.ne.s32.totalorder %s6970_s24, %s5849_s7  ;;  %p5854_p2 = scmp.lt.u32.totalorder %s6970_s24, %s7239_s2 }
 0xfd5   : > { %p5855_p5 = scmp.lt.u32.totalorder %s5853_s1, %s5849_s7  ;;  %p5857_p9 = scmp.lt.u32.totalorder %s5849_s7, %s6970_s24 }
 0xfd6   : > { %p5851_p13 = pnand %p5850_p11, %p7242_p10 }
 0xfd7   : > { %p5856_p6 = por %p5855_p5, %p5854_p2 }
 0xfd8   : > { %p5852_p1 = pneg %p5851_p13 }
 0xfd9   : > { %p5858_p12 = por %p5857_p9, %p5856_p6 }
 0xfdb   : > { %p5859_p0 = pnand %p5858_p12, %p5852_p1 }
 0xfdd   : > { %5862 = shalt.err (!%p5859_p0)
}
 0xfde   : > { %5585 = dma.vmem_to_hbm [thread:$0]  (%p7242_p10), %s6972_s22, 16, %s6970_s24, %s4757_s25  }
 0xfdf PF: > { %p5597_p3 = scmp.ge.s32.totalorder %s5929_s6, 2  ;;  %s4781_s26 = sand.u32 1, %s5917_s15  }
 0xfe0   : > { %p7243_p4 = scmp.ne.s32.totalorder %s7097_s16, 0  ;;  %s4782_s8 = scalar_lea.sflag [#allocation15], %s4781_s26 }
 0xfe2   : > { %p5592_p7 = pnand %p5597_p3, %p7243_p4 }
 0xfe4   : > { %5912 = dma.done.wait (!%p5592_p7), %s4782_s8, 16  }
 0xfe5   : > { %5914 = vsyncadd (!%p5592_p7), %s4782_s8, 4294967280  ;;  %p150_p8 = scmp.ge.s32.totalorder %s6331_s11, 4   ;;  %s7244_s15 = smov %s5921_s18 }
 0xfe6   : > { %s7245_s18 = smov %s5925_s0  ;;  %s7246_s0 = smov %s6342_s13 }
 0xfe7   : > { %s7247_s6 = smov %s6331_s11  ;;  %152 = sbr.rel (!%p150_p8) target bundleno = 115 (0x73), region = 407 }
 0xfee   :  { %4786 = vsyncpa [#allocation14], 1 }
 0xfef   :  { %4788 = vsyncpa [#allocation14 + $0x1], 1 }
 0xff0   :  { %4789 = vsyncpa [#allocation15], 1 }
 0xff1   :  { %4791 = vsyncpa [#allocation15 + $0x1], 1 }

</bundles_post_ra>
